<compile_context>
chip_gen: v5e
topology: v5e:2x2
jax: 0.10.0
libtpu: 0.0.40
codegen_flags: <defaults>
</compile_context>

<pallas_src>
import functools

import jax
import jax.numpy as jnp
from jax.experimental import pallas as pl
from jax.experimental.pallas import tpu as pltpu

EPS = 1e-5


def _round_up(x, m):
    return (x + m - 1) // m * m


def _pick_row_tiles(n_batch, ho, wo):
    """Output-row tiles per image: aim for >=4 parallel grid steps total
    without shrinking the per-step matmul below ~128 rows."""
    best = 1
    for r in range(1, ho + 1):
        if ho % r:
            continue
        t = ho // r
        if r > 1 and ((t * wo) % 8 or t * wo < 128):
            continue
        best = r
        if n_batch * r >= 4:
            break
    return best


# ----------------------------- Pallas kernel -------------------------------

def _conv_bn_act_kernel(*refs, taps, t_rows, wo, cin, relu, has_res):
    """Fused conv (taps = shifted dots) + folded-BN bias (+residual) + ReLU.

    refs = (x_ref, w_ref, b_ref, [res_ref,] o_ref)
      x_ref : (P, Hrows, Wcols, cin) bf16 — whole (phase-split) padded image
      w_ref : (n_taps, cin, Cp)      bf16 — BN scale folded in, fully resident
      b_ref : (1, Cp)                f32  — folded BN bias
      res   : (1, t_rows*wo, Cp)          — optional pre-activation residual
      o_ref : (1, t_rows*wo, Cp)
    """
    if has_res:
        x_ref, w_ref, b_ref, res_ref, o_ref = refs
    else:
        x_ref, w_ref, b_ref, o_ref = refs

    r0 = pl.program_id(1) * t_rows          # first output row of this tile
    acc = None
    for idx, (ro, ph, co) in enumerate(taps):
        tap = x_ref[ph, pl.ds(r0 + ro, t_rows), co:co + wo, :]   # (t_rows, wo, cin)
        tap = tap.reshape(t_rows * wo, cin)
        contrib = jnp.dot(tap, w_ref[idx], preferred_element_type=jnp.float32)
        acc = contrib if acc is None else acc + contrib

    out = acc + b_ref[...]
    if has_res:
        out = out + res_ref[0].astype(jnp.float32)
    if relu:
        out = jnp.maximum(out, 0.0)
    o_ref[0] = out.astype(o_ref.dtype)


# ------------------------------- wrapper ------------------------------------

def fused_conv_bn_act(x_nhwc, w_oihw, gamma, beta, mean, var, *, stride,
                      residual=None, relu=True, out_dtype=jnp.bfloat16):
    """conv(kxk, k in {1,3}) + BN (folded) + optional residual add + ReLU.

    Returns (out_flat, ho, wo, cp) with out_flat of shape (N, ho*wo, cp)
    where cp = round_up(out_channels, 128); padded channels are exactly 0.
    """
    n, h, w, cx = x_nhwc.shape
    o, i, kh, kw = w_oihw.shape
    assert kh == kw and kh in (1, 3) and i <= cx
    k = kh
    cp = _round_up(o, 128)

    scale = gamma / jnp.sqrt(var + EPS)
    bias = beta - mean * scale

    # ---- arrange activation so every conv tap is a unit-stride slice --------
    if k == 3:
        assert stride in (1, 2)
        ho, wo = h // stride, w // stride
        # TODO(synk): fold the 1-pixel halo pad into the kernel with masked
        # edge taps to remove this single extra bf16 pass over the activation.
        xp = jnp.pad(x_nhwc.astype(jnp.bfloat16), ((0, 0), (1, 1), (1, 1), (0, 0)))
        if stride == 1:
            xa = xp                                        # (N, H+2, W+2, cx)
            taps = tuple((dh, 0, dw) for dh in range(3) for dw in range(3))
            p = 1
        else:
            # TODO(synk): odd spatial dims with stride 2 need one extra pad row/col.
            assert h % 2 == 0 and w % 2 == 0
            hp, wp = h + 2, w + 2
            xa = xp.reshape(n, hp // 2, 2, wp // 2, 2, cx)
            xa = jnp.transpose(xa, (0, 2, 4, 1, 3, 5))     # (N, hφ, wφ, H/2, W/2, C)
            xa = xa.reshape(n * 4, hp // 2, wp // 2, cx)   # phase-major space-to-depth
            taps = tuple((dh // 2, (dh % 2) * 2 + (dw % 2), dw // 2)
                         for dh in range(3) for dw in range(3))
            p = 4
    else:  # 1x1 conv, padding 0 — stride handled by a cheap wrapper subsample
        xa = x_nhwc[:, ::stride, ::stride, :].astype(jnp.bfloat16)
        ho, wo = xa.shape[1], xa.shape[2]
        taps = ((0, 0, 0),)
        p = 1
    hrows, wcols = xa.shape[1], xa.shape[2]

    # ---- weights: per-tap (cx, cp), BN scale folded, zero-padded ------------
    mats = [jnp.transpose(w_oihw[:, :, dh, dw], (1, 0))
            for dh in range(k) for dw in range(k)]          # same order as `taps`
    wst = jnp.stack(mats, axis=0) * scale[None, None, :]
    wst = jnp.pad(wst, ((0, 0), (0, cx - i), (0, cp - o))).astype(jnp.bfloat16)
    b_arr = jnp.pad(bias, (0, cp - o)).astype(jnp.float32).reshape(1, cp)

    # ---- grid / tiling -------------------------------------------------------
    r_tiles = _pick_row_tiles(n, ho, wo)
    t_rows = ho // r_tiles
    m_blk = t_rows * wo
    grid = (n, r_tiles)

    kernel = functools.partial(_conv_bn_act_kernel, taps=taps, t_rows=t_rows,
                               wo=wo, cin=cx, relu=relu,
                               has_res=residual is not None)

    in_specs = [
        pl.BlockSpec((p, hrows, wcols, cx), lambda b, t: (b, 0, 0, 0)),  # image, resident across t
        pl.BlockSpec(wst.shape, lambda b, t: (0, 0, 0)),                 # full weight, resident
        pl.BlockSpec((1, cp), lambda b, t: (0, 0)),                      # bias, resident
    ]
    args = [xa, wst, b_arr]
    if residual is not None:
        in_specs.append(pl.BlockSpec((1, m_blk, cp), lambda b, t: (b, t, 0)))
        args.append(residual)

    out_itemsize = jnp.dtype(out_dtype).itemsize
    res_blk_bytes = (m_blk * cp * residual.dtype.itemsize) if residual is not None else 0
    vmem_est = (2 * (p * hrows * wcols * cx * 2 + wst.size * 2 + cp * 4
                     + m_blk * cp * out_itemsize + res_blk_bytes)
                + 3 * m_blk * cp * 4)                     # f32 tap accumulation headroom
    vmem_limit = int(min(48 * 2 ** 20, max(32 * 2 ** 20, 2 * vmem_est)))

    bytes_accessed = int(xa.size * 2 + wst.size * 2 + b_arr.size * 4
                         + n * ho * wo * cp * out_itemsize
                         + (residual.size * residual.dtype.itemsize
                            if residual is not None else 0))

    out = pl.pallas_call(
        kernel,
        out_shape=jax.ShapeDtypeStruct((n, ho * wo, cp), out_dtype),
        grid=grid,
        in_specs=in_specs,
        out_specs=pl.BlockSpec((1, m_blk, cp), lambda b, t: (b, t, 0)),
        compiler_params=pltpu.CompilerParams(
            dimension_semantics=("parallel", "parallel"),
            vmem_limit_bytes=vmem_limit,
        ),
        cost_estimate=pl.CostEstimate(
            flops=2 * n * ho * wo * cx * cp * len(taps),
            transcendentals=0,
            bytes_accessed=bytes_accessed,
        ),
    )(*args)
    return out, ho, wo, cp


# --------------------------- BasicBlock forward ------------------------------

def basic_block_forward(x_nchw, params, stride):
    x = jnp.transpose(x_nchw, (0, 2, 3, 1)).astype(jnp.float32)   # NHWC
    n, h, w, cin = x.shape
    planes = params["w1"].shape[0]

    # conv1 (3x3, stride) + bn1 + relu   -> bf16, channels padded to cp (zeros)
    out1, ho, wo, cp = fused_conv_bn_act(
        x, params["w1"], params["g1"], params["be1"], params["m1"], params["v1"],
        stride=stride, relu=True, out_dtype=jnp.bfloat16)
    out1_nhwc = out1.reshape(n, ho, wo, cp)                       # free reshape

    # shortcut -> (n, ho*wo, cp); conv-shortcut padded channels are exactly 0
    if stride != 1 or cin != planes:
        sc, _, _, _ = fused_conv_bn_act(
            x, params["ws"], params["gs"], params["bes"], params["ms"], params["vs"],
            stride=stride, relu=False, out_dtype=jnp.bfloat16)
    else:
        sc = jnp.pad(x.reshape(n, h * w, cin), ((0, 0), (0, 0), (0, cp - cin)))

    # conv2 (3x3, stride 1) + bn2 + residual add + relu -> f32
    out2, _, _, _ = fused_conv_bn_act(
        out1_nhwc, params["w2"], params["g2"], params["be2"], params["m2"], params["v2"],
        stride=1, residual=sc, relu=True, out_dtype=jnp.float32)

    out = out2.reshape(n, ho, wo, cp)[:, :, :, :planes]
    return jnp.transpose(out, (0, 3, 1, 2))                       # back to NCHW


# --------------------------- pure-JAX reference -----------------------------

def ref_forward(x, params, stride):
    def conv(x, w, s, pad):
        return jax.lax.conv_general_dilated(
            x, w, (s, s), [(pad, pad), (pad, pad)],
            dimension_numbers=("NCHW", "OIHW", "NCHW"))

    def bn(x, g, b, m, v):
        return ((x - m[None, :, None, None])
                * (g / jnp.sqrt(v + EPS))[None, :, None, None]
                + b[None, :, None, None])

    out = jax.nn.relu(bn(conv(x, params["w1"], stride, 1),
                         params["g1"], params["be1"], params["m1"], params["v1"]))
    out = bn(conv(out, params["w2"], 1, 1),
             params["g2"], params["be2"], params["m2"], params["v2"])
    planes, cin = params["w1"].shape[0], params["w1"].shape[1]
    if stride != 1 or cin != planes:
        sc = bn(conv(x, params["ws"], stride, 0),
                params["gs"], params["bes"], params["ms"], params["vs"])
    else:
        sc = x
    return jax.nn.relu(out + sc)


# --------------------------------- main --------------------------------------

def make_params(key, in_planes, planes, with_shortcut):
    ks = jax.random.split(key, 16)
    params = {
        "w1": 0.1 * jax.random.normal(ks[0], (planes, in_planes, 3, 3), jnp.float32),
        "g1": 1.0 + 0.1 * jax.random.normal(ks[1], (planes,), jnp.float32),
        "be1": 0.1 * jax.random.normal(ks[2], (planes,), jnp.float32),
        "m1": 0.1 * jax.random.normal(ks[3], (planes,), jnp.float32),
        "v1": 1.0 + 0.1 * jax.random.uniform(ks[4], (planes,), jnp.float32),
        "w2": 0.1 * jax.random.normal(ks[5], (planes, planes, 3, 3), jnp.float32),
        "g2": 1.0 + 0.1 * jax.random.normal(ks[6], (planes,), jnp.float32),
        "be2": 0.1 * jax.random.normal(ks[7], (planes,), jnp.float32),
        "m2": 0.1 * jax.random.normal(ks[8], (planes,), jnp.float32),
        "v2": 1.0 + 0.1 * jax.random.uniform(ks[9], (planes,), jnp.float32),
    }
    if with_shortcut:
        params.update({
            "ws": 0.1 * jax.random.normal(ks[10], (planes, in_planes, 1, 1), jnp.float32),
            "gs": 1.0 + 0.1 * jax.random.normal(ks[11], (planes,), jnp.float32),
            "bes": 0.1 * jax.random.normal(ks[12], (planes,), jnp.float32),
            "ms": 0.1 * jax.random.normal(ks[13], (planes,), jnp.float32),
            "vs": 1.0 + 0.1 * jax.random.uniform(ks[14], (planes,), jnp.float32),
        })
    return params


if __name__ == "__main__":
    key = jax.random.PRNGKey(0)
    k_par1, k_x1, k_par2, k_x2 = jax.random.split(key, 4)

    fwd = jax.jit(basic_block_forward, static_argnums=2)

    # Case 1: strided block with conv shortcut (stride 2, in_planes != planes).
    n, in_planes, planes, h, w, stride = 2, 4, 8, 16, 16, 2
    params1 = make_params(k_par1, in_planes, planes, with_shortcut=True)
    x1 = jax.random.normal(k_x1, (n, in_planes, h, w), jnp.float32)

    out1 = jax.block_until_ready(fwd(x1, params1, stride))
    ref1 = jax.block_until_ready(ref_forward(x1, params1, stride))
    assert out1.shape == ref1.shape == (n, planes, h // stride, w // stride)
    # bf16 MXU inputs with f32 accumulation -> relaxed tolerance vs the f32 ref.
    assert jnp.allclose(out1, ref1, rtol=5e-2, atol=5e-2), \
        float(jnp.max(jnp.abs(out1 - ref1)))

    # Case 2: identity shortcut (stride 1, in_planes == planes).
    params2 = make_params(k_par2, planes, planes, with_shortcut=False)
    x2 = jax.random.normal(k_x2, (n, planes, h, w), jnp.float32)
    out2 = jax.block_until_ready(fwd(x2, params2, 1))
    ref2 = jax.block_until_ready(ref_forward(x2, params2, 1))
    assert out2.shape == ref2.shape == (n, planes, h, w)
    assert jnp.allclose(out2, ref2, rtol=5e-2, atol=5e-2), \
        float(jnp.max(jnp.abs(out2 - ref2)))

    print("KERNEL_OK")
</pallas_src>

<mosaic_0001>
module attributes {stable_mosaic.version = 11 : i64} {
  func.func @_conv_bn_act_kernel(%arg0: i32, %arg1: i32, %arg2: memref<1x8x8x4xbf16, #tpu.memory_space<vmem>>, %arg3: memref<1x4x128xbf16, #tpu.memory_space<vmem>>, %arg4: memref<1x128xf32, #tpu.memory_space<vmem>>, %arg5: memref<1x64x128xbf16, #tpu.memory_space<vmem>>) attributes {dimension_semantics = [#tpu.dimension_semantics<parallel>, #tpu.dimension_semantics<parallel>], iteration_bounds = array<i64: 2, 1>, scalar_prefetch = 0 : i64, scratch_operands = 0 : i64, tpu.core_type = #tpu.core_type<tc>, window_params = [{transform_indices = @transform_0, window_bounds = array<i64: 1, 8, 8, 4>}, {pipeline_mode = #tpu.pipeline_mode<synchronous>, transform_indices = @transform_1, window_bounds = array<i64: 1, 4, 128>}, {pipeline_mode = #tpu.pipeline_mode<synchronous>, transform_indices = @transform_2, window_bounds = array<i64: 1, 128>}, {transform_indices = @transform_3, window_bounds = array<i64: 1, 64, 128>}]} {
    %c8_i32 = arith.constant 8 : i32
    %0 = arith.muli %arg1, %c8_i32 : i32
    %c0_i32 = arith.constant 0 : i32
    %1 = arith.addi %0, %c0_i32 : i32
    %c0 = arith.constant 0 : index
    %2 = arith.index_cast %1 : i32 to index
    %c0_0 = arith.constant 0 : index
    %c0_1 = arith.constant 0 : index
    %3 = vector.load %arg2[%c0, %2, %c0_0, %c0_1] : memref<1x8x8x4xbf16, #tpu.memory_space<vmem>>, vector<1x8x8x4xbf16>
    %4 = vector.shape_cast %3 : vector<1x8x8x4xbf16> to vector<8x8x4xbf16>
    %5 = vector.shape_cast %4 : vector<8x8x4xbf16> to vector<64x4xbf16>
    %c0_2 = arith.constant 0 : index
    %c0_3 = arith.constant 0 : index
    %c0_4 = arith.constant 0 : index
    %6 = vector.load %arg3[%c0_2, %c0_3, %c0_4] : memref<1x4x128xbf16, #tpu.memory_space<vmem>>, vector<1x4x128xbf16>
    %7 = vector.shape_cast %6 : vector<1x4x128xbf16> to vector<4x128xbf16>
    %cst = arith.constant dense<0.000000e+00> : vector<64x128xf32>
    %8 = tpu.matmul %5, %7, %cst {dimension_numbers = #tpu.dot_dimension_numbers<[1], [0], [0], [1], [0, 0, 1, 1], [], []>} : vector<64x4xbf16>, vector<4x128xbf16>, vector<64x128xf32> -> vector<64x128xf32>
    %c0_5 = arith.constant 0 : index
    %c0_6 = arith.constant 0 : index
    %9 = vector.load %arg4[%c0_5, %c0_6] : memref<1x128xf32, #tpu.memory_space<vmem>>, vector<1x128xf32>
    %10 = vector.broadcast %9 : vector<1x128xf32> to vector<64x128xf32>
    %11 = arith.addf %8, %10 : vector<64x128xf32>
    %12 = arith.truncf %11 : vector<64x128xf32> to vector<64x128xbf16>
    %c0_7 = arith.constant 0 : index
    %c0_8 = arith.constant 0 : index
    %c0_9 = arith.constant 0 : index
    %13 = vector.load %arg5[%c0_7, %c0_8, %c0_9] : memref<1x64x128xbf16, #tpu.memory_space<vmem>>, vector<1x64x128xbf16>
    %14 = vector.shape_cast %13 : vector<1x64x128xbf16> to vector<64x128xbf16>
    %15 = vector.shape_cast %12 : vector<64x128xbf16> to vector<1x64x128xbf16>
    tpu.vector_store %arg5[%c0_7, %c0_8, %c0_9], %15 {strides = array<i32>} : memref<1x64x128xbf16, #tpu.memory_space<vmem>>, vector<1x64x128xbf16>,
    return
  }
  func.func @transform_0(%arg0: i32, %arg1: i32) -> (i32, i32, i32, i32) {
    %c0_i32 = arith.constant 0 : i32
    %c0_i32_0 = arith.constant 0 : i32
    %c0_i32_1 = arith.constant 0 : i32
    %c0_i32_2 = arith.constant 0 : i32
    return %arg0, %c0_i32, %c0_i32_0, %c0_i32_1 : i32, i32, i32, i32
  }
  func.func @transform_1(%arg0: i32, %arg1: i32) -> (i32, i32, i32) {
    %c0_i32 = arith.constant 0 : i32
    %c0_i32_0 = arith.constant 0 : i32
    %c0_i32_1 = arith.constant 0 : i32
    %c0_i32_2 = arith.constant 0 : i32
    return %c0_i32, %c0_i32_0, %c0_i32_1 : i32, i32, i32
  }
  func.func @transform_2(%arg0: i32, %arg1: i32) -> (i32, i32) {
    %c0_i32 = arith.constant 0 : i32
    %c0_i32_0 = arith.constant 0 : i32
    %c0_i32_1 = arith.constant 0 : i32
    return %c0_i32, %c0_i32_0 : i32, i32
  }
  func.func @transform_3(%arg0: i32, %arg1: i32) -> (i32, i32, i32) {
    %c0_i32 = arith.constant 0 : i32
    %c0_i32_0 = arith.constant 0 : i32
    return %arg0, %arg1, %c0_i32 : i32, i32, i32
  }
}

module attributes {stable_mosaic.version = 11 : i64} {
  func.func @_conv_bn_act_kernel(%arg0: i32, %arg1: i32, %arg2: memref<4x9x9x4xbf16, #tpu.memory_space<vmem>>, %arg3: memref<9x4x128xbf16, #tpu.memory_space<vmem>>, %arg4: memref<1x128xf32, #tpu.memory_space<vmem>>, %arg5: memref<1x64x128xbf16, #tpu.memory_space<vmem>>) attributes {dimension_semantics = [#tpu.dimension_semantics<parallel>, #tpu.dimension_semantics<parallel>], iteration_bounds = array<i64: 2, 1>, scalar_prefetch = 0 : i64, scratch_operands = 0 : i64, tpu.core_type = #tpu.core_type<tc>, window_params = [{transform_indices = @transform_0, window_bounds = array<i64: 4, 9, 9, 4>}, {pipeline_mode = #tpu.pipeline_mode<synchronous>, transform_indices = @transform_1, window_bounds = array<i64: 9, 4, 128>}, {pipeline_mode = #tpu.pipeline_mode<synchronous>, transform_indices = @transform_2, window_bounds = array<i64: 1, 128>}, {transform_indices = @transform_3, window_bounds = array<i64: 1, 64, 128>}]} {
    %c8_i32 = arith.constant 8 : i32
    %0 = arith.muli %arg1, %c8_i32 : i32
    %c0_i32 = arith.constant 0 : i32
    %1 = arith.addi %0, %c0_i32 : i32
    %c0 = arith.constant 0 : index
    %2 = arith.index_cast %1 : i32 to index
    %c0_0 = arith.constant 0 : index
    %c0_1 = arith.constant 0 : index
    %3 = vector.load %arg2[%c0, %2, %c0_0, %c0_1] : memref<4x9x9x4xbf16, #tpu.memory_space<vmem>>, vector<1x8x8x4xbf16>
    %4 = vector.shape_cast %3 : vector<1x8x8x4xbf16> to vector<8x8x4xbf16>
    %5 = vector.shape_cast %4 : vector<8x8x4xbf16> to vector<64x4xbf16>
    %c0_2 = arith.constant 0 : index
    %c0_3 = arith.constant 0 : index
    %c0_4 = arith.constant 0 : index
    %6 = vector.load %arg3[%c0_2, %c0_3, %c0_4] : memref<9x4x128xbf16, #tpu.memory_space<vmem>>, vector<1x4x128xbf16>
    %7 = vector.shape_cast %6 : vector<1x4x128xbf16> to vector<4x128xbf16>
    %cst = arith.constant dense<0.000000e+00> : vector<64x128xf32>
    %8 = tpu.matmul %5, %7, %cst {dimension_numbers = #tpu.dot_dimension_numbers<[1], [0], [0], [1], [0, 0, 1, 1], [], []>} : vector<64x4xbf16>, vector<4x128xbf16>, vector<64x128xf32> -> vector<64x128xf32>
    %c0_i32_5 = arith.constant 0 : i32
    %9 = arith.addi %0, %c0_i32_5 : i32
    %c1 = arith.constant 1 : index
    %10 = arith.index_cast %9 : i32 to index
    %c0_6 = arith.constant 0 : index
    %c0_7 = arith.constant 0 : index
    %11 = vector.load %arg2[%c1, %10, %c0_6, %c0_7] : memref<4x9x9x4xbf16, #tpu.memory_space<vmem>>, vector<1x8x8x4xbf16>
    %12 = vector.shape_cast %11 : vector<1x8x8x4xbf16> to vector<8x8x4xbf16>
    %13 = vector.shape_cast %12 : vector<8x8x4xbf16> to vector<64x4xbf16>
    %c1_8 = arith.constant 1 : index
    %c0_9 = arith.constant 0 : index
    %c0_10 = arith.constant 0 : index
    %14 = vector.load %arg3[%c1_8, %c0_9, %c0_10] : memref<9x4x128xbf16, #tpu.memory_space<vmem>>, vector<1x4x128xbf16>
    %15 = vector.shape_cast %14 : vector<1x4x128xbf16> to vector<4x128xbf16>
    %cst_11 = arith.constant dense<0.000000e+00> : vector<64x128xf32>
    %16 = tpu.matmul %13, %15, %cst_11 {dimension_numbers = #tpu.dot_dimension_numbers<[1], [0], [0], [1], [0, 0, 1, 1], [], []>} : vector<64x4xbf16>, vector<4x128xbf16>, vector<64x128xf32> -> vector<64x128xf32>
    %17 = arith.addf %8, %16 : vector<64x128xf32>
    %c0_i32_12 = arith.constant 0 : i32
    %18 = arith.addi %0, %c0_i32_12 : i32
    %c0_13 = arith.constant 0 : index
    %19 = arith.index_cast %18 : i32 to index
    %c1_14 = arith.constant 1 : index
    %c0_15 = arith.constant 0 : index
    %20 = vector.load %arg2[%c0_13, %19, %c1_14, %c0_15] : memref<4x9x9x4xbf16, #tpu.memory_space<vmem>>, vector<1x8x8x4xbf16>
    %21 = vector.shape_cast %20 : vector<1x8x8x4xbf16> to vector<8x8x4xbf16>
    %22 = vector.shape_cast %21 : vector<8x8x4xbf16> to vector<64x4xbf16>
    %c2 = arith.constant 2 : index
    %c0_16 = arith.constant 0 : index
    %c0_17 = arith.constant 0 : index
    %23 = vector.load %arg3[%c2, %c0_16, %c0_17] : memref<9x4x128xbf16, #tpu.memory_space<vmem>>, vector<1x4x128xbf16>
    %24 = vector.shape_cast %23 : vector<1x4x128xbf16> to vector<4x128xbf16>
    %cst_18 = arith.constant dense<0.000000e+00> : vector<64x128xf32>
    %25 = tpu.matmul %22, %24, %cst_18 {dimension_numbers = #tpu.dot_dimension_numbers<[1], [0], [0], [1], [0, 0, 1, 1], [], []>} : vector<64x4xbf16>, vector<4x128xbf16>, vector<64x128xf32> -> vector<64x128xf32>
    %26 = arith.addf %17, %25 : vector<64x128xf32>
    %c0_i32_19 = arith.constant 0 : i32
    %27 = arith.addi %0, %c0_i32_19 : i32
    %c2_20 = arith.constant 2 : index
    %28 = arith.index_cast %27 : i32 to index
    %c0_21 = arith.constant 0 : index
    %c0_22 = arith.constant 0 : index
    %29 = vector.load %arg2[%c2_20, %28, %c0_21, %c0_22] : memref<4x9x9x4xbf16, #tpu.memory_space<vmem>>, vector<1x8x8x4xbf16>
    %30 = vector.shape_cast %29 : vector<1x8x8x4xbf16> to vector<8x8x4xbf16>
    %31 = vector.shape_cast %30 : vector<8x8x4xbf16> to vector<64x4xbf16>
    %c3 = arith.constant 3 : index
    %c0_23 = arith.constant 0 : index
    %c0_24 = arith.constant 0 : index
    %32 = vector.load %arg3[%c3, %c0_23, %c0_24] : memref<9x4x128xbf16, #tpu.memory_space<vmem>>, vector<1x4x128xbf16>
    %33 = vector.shape_cast %32 : vector<1x4x128xbf16> to vector<4x128xbf16>
    %cst_25 = arith.constant dense<0.000000e+00> : vector<64x128xf32>
    %34 = tpu.matmul %31, %33, %cst_25 {dimension_numbers = #tpu.dot_dimension_numbers<[1], [0], [0], [1], [0, 0, 1, 1], [], []>} : vector<64x4xbf16>, vector<4x128xbf16>, vector<64x128xf32> -> vector<64x128xf32>
    %35 = arith.addf %26, %34 : vector<64x128xf32>
    %c0_i32_26 = arith.constant 0 : i32
    %36 = arith.addi %0, %c0_i32_26 : i32
    %c3_27 = arith.constant 3 : index
    %37 = arith.index_cast %36 : i32 to index
    %c0_28 = arith.constant 0 : index
    %c0_29 = arith.constant 0 : index
    %38 = vector.load %arg2[%c3_27, %37, %c0_28, %c0_29] : memref<4x9x9x4xbf16, #tpu.memory_space<vmem>>, vector<1x8x8x4xbf16>
    %39 = vector.shape_cast %38 : vector<1x8x8x4xbf16> to vector<8x8x4xbf16>
    %40 = vector.shape_cast %39 : vector<8x8x4xbf16> to vector<64x4xbf16>
    %c4 = arith.constant 4 : index
    %c0_30 = arith.constant 0 : index
    %c0_31 = arith.constant 0 : index
    %41 = vector.load %arg3[%c4, %c0_30, %c0_31] : memref<9x4x128xbf16, #tpu.memory_space<vmem>>, vector<1x4x128xbf16>
    %42 = vector.shape_cast %41 : vector<1x4x128xbf16> to vector<4x128xbf16>
    %cst_32 = arith.constant dense<0.000000e+00> : vector<64x128xf32>
    %43 = tpu.matmul %40, %42, %cst_32 {dimension_numbers = #tpu.dot_dimension_numbers<[1], [0], [0], [1], [0, 0, 1, 1], [], []>} : vector<64x4xbf16>, vector<4x128xbf16>, vector<64x128xf32> -> vector<64x128xf32>
    %44 = arith.addf %35, %43 : vector<64x128xf32>
    %c0_i32_33 = arith.constant 0 : i32
    %45 = arith.addi %0, %c0_i32_33 : i32
    %c2_34 = arith.constant 2 : index
    %46 = arith.index_cast %45 : i32 to index
    %c1_35 = arith.constant 1 : index
    %c0_36 = arith.constant 0 : index
    %47 = vector.load %arg2[%c2_34, %46, %c1_35, %c0_36] : memref<4x9x9x4xbf16, #tpu.memory_space<vmem>>, vector<1x8x8x4xbf16>
    %48 = vector.shape_cast %47 : vector<1x8x8x4xbf16> to vector<8x8x4xbf16>
    %49 = vector.shape_cast %48 : vector<8x8x4xbf16> to vector<64x4xbf16>
    %c5 = arith.constant 5 : index
    %c0_37 = arith.constant 0 : index
    %c0_38 = arith.constant 0 : index
    %50 = vector.load %arg3[%c5, %c0_37, %c0_38] : memref<9x4x128xbf16, #tpu.memory_space<vmem>>, vector<1x4x128xbf16>
    %51 = vector.shape_cast %50 : vector<1x4x128xbf16> to vector<4x128xbf16>
    %cst_39 = arith.constant dense<0.000000e+00> : vector<64x128xf32>
    %52 = tpu.matmul %49, %51, %cst_39 {dimension_numbers = #tpu.dot_dimension_numbers<[1], [0], [0], [1], [0, 0, 1, 1], [], []>} : vector<64x4xbf16>, vector<4x128xbf16>, vector<64x128xf32> -> vector<64x128xf32>
    %53 = arith.addf %44, %52 : vector<64x128xf32>
    %c1_i32 = arith.constant 1 : i32
    %54 = arith.addi %0, %c1_i32 : i32
    %c0_40 = arith.constant 0 : index
    %55 = arith.index_cast %54 : i32 to index
    %c0_41 = arith.constant 0 : index
    %c0_42 = arith.constant 0 : index
    %56 = vector.load %arg2[%c0_40, %55, %c0_41, %c0_42] : memref<4x9x9x4xbf16, #tpu.memory_space<vmem>>, vector<1x8x8x4xbf16>
    %57 = vector.shape_cast %56 : vector<1x8x8x4xbf16> to vector<8x8x4xbf16>
    %58 = vector.shape_cast %57 : vector<8x8x4xbf16> to vector<64x4xbf16>
    %c6 = arith.constant 6 : index
    %c0_43 = arith.constant 0 : index
    %c0_44 = arith.constant 0 : index
    %59 = vector.load %arg3[%c6, %c0_43, %c0_44] : memref<9x4x128xbf16, #tpu.memory_space<vmem>>, vector<1x4x128xbf16>
    %60 = vector.shape_cast %59 : vector<1x4x128xbf16> to vector<4x128xbf16>
    %cst_45 = arith.constant dense<0.000000e+00> : vector<64x128xf32>
    %61 = tpu.matmul %58, %60, %cst_45 {dimension_numbers = #tpu.dot_dimension_numbers<[1], [0], [0], [1], [0, 0, 1, 1], [], []>} : vector<64x4xbf16>, vector<4x128xbf16>, vector<64x128xf32> -> vector<64x128xf32>
    %62 = arith.addf %53, %61 : vector<64x128xf32>
    %c1_i32_46 = arith.constant 1 : i32
    %63 = arith.addi %0, %c1_i32_46 : i32
    %c1_47 = arith.constant 1 : index
    %64 = arith.index_cast %63 : i32 to index
    %c0_48 = arith.constant 0 : index
    %c0_49 = arith.constant 0 : index
    %65 = vector.load %arg2[%c1_47, %64, %c0_48, %c0_49] : memref<4x9x9x4xbf16, #tpu.memory_space<vmem>>, vector<1x8x8x4xbf16>
    %66 = vector.shape_cast %65 : vector<1x8x8x4xbf16> to vector<8x8x4xbf16>
    %67 = vector.shape_cast %66 : vector<8x8x4xbf16> to vector<64x4xbf16>
    %c7 = arith.constant 7 : index
    %c0_50 = arith.constant 0 : index
    %c0_51 = arith.constant 0 : index
    %68 = vector.load %arg3[%c7, %c0_50, %c0_51] : memref<9x4x128xbf16, #tpu.memory_space<vmem>>, vector<1x4x128xbf16>
    %69 = vector.shape_cast %68 : vector<1x4x128xbf16> to vector<4x128xbf16>
    %cst_52 = arith.constant dense<0.000000e+00> : vector<64x128xf32>
    %70 = tpu.matmul %67, %69, %cst_52 {dimension_numbers = #tpu.dot_dimension_numbers<[1], [0], [0], [1], [0, 0, 1, 1], [], []>} : vector<64x4xbf16>, vector<4x128xbf16>, vector<64x128xf32> -> vector<64x128xf32>
    %71 = arith.addf %62, %70 : vector<64x128xf32>
    %c1_i32_53 = arith.constant 1 : i32
    %72 = arith.addi %0, %c1_i32_53 : i32
    %c0_54 = arith.constant 0 : index
    %73 = arith.index_cast %72 : i32 to index
    %c1_55 = arith.constant 1 : index
    %c0_56 = arith.constant 0 : index
    %74 = vector.load %arg2[%c0_54, %73, %c1_55, %c0_56] : memref<4x9x9x4xbf16, #tpu.memory_space<vmem>>, vector<1x8x8x4xbf16>
    %75 = vector.shape_cast %74 : vector<1x8x8x4xbf16> to vector<8x8x4xbf16>
    %76 = vector.shape_cast %75 : vector<8x8x4xbf16> to vector<64x4xbf16>
    %c8 = arith.constant 8 : index
    %c0_57 = arith.constant 0 : index
    %c0_58 = arith.constant 0 : index
    %77 = vector.load %arg3[%c8, %c0_57, %c0_58] : memref<9x4x128xbf16, #tpu.memory_space<vmem>>, vector<1x4x128xbf16>
    %78 = vector.shape_cast %77 : vector<1x4x128xbf16> to vector<4x128xbf16>
    %cst_59 = arith.constant dense<0.000000e+00> : vector<64x128xf32>
    %79 = tpu.matmul %76, %78, %cst_59 {dimension_numbers = #tpu.dot_dimension_numbers<[1], [0], [0], [1], [0, 0, 1, 1], [], []>} : vector<64x4xbf16>, vector<4x128xbf16>, vector<64x128xf32> -> vector<64x128xf32>
    %80 = arith.addf %71, %79 : vector<64x128xf32>
    %c0_60 = arith.constant 0 : index
    %c0_61 = arith.constant 0 : index
    %81 = vector.load %arg4[%c0_60, %c0_61] : memref<1x128xf32, #tpu.memory_space<vmem>>, vector<1x128xf32>
    %82 = vector.broadcast %81 : vector<1x128xf32> to vector<64x128xf32>
    %83 = arith.addf %80, %82 : vector<64x128xf32>
    %cst_62 = arith.constant 0.000000e+00 : f32
    %84 = vector.broadcast %cst_62 : f32 to vector<64x128xf32>
    %85 = arith.maximumf %83, %84 : vector<64x128xf32>
    %86 = arith.truncf %85 : vector<64x128xf32> to vector<64x128xbf16>
    %c0_63 = arith.constant 0 : index
    %c0_64 = arith.constant 0 : index
    %c0_65 = arith.constant 0 : index
    %87 = vector.load %arg5[%c0_63, %c0_64, %c0_65] : memref<1x64x128xbf16, #tpu.memory_space<vmem>>, vector<1x64x128xbf16>
    %88 = vector.shape_cast %87 : vector<1x64x128xbf16> to vector<64x128xbf16>
    %89 = vector.shape_cast %86 : vector<64x128xbf16> to vector<1x64x128xbf16>
    tpu.vector_store %arg5[%c0_63, %c0_64, %c0_65], %89 {strides = array<i32>} : memref<1x64x128xbf16, #tpu.memory_space<vmem>>, vector<1x64x128xbf16>,
    return
  }
  func.func @transform_0(%arg0: i32, %arg1: i32) -> (i32, i32, i32, i32) {
    %c0_i32 = arith.constant 0 : i32
    %c0_i32_0 = arith.constant 0 : i32
    %c0_i32_1 = arith.constant 0 : i32
    %c0_i32_2 = arith.constant 0 : i32
    return %arg0, %c0_i32, %c0_i32_0, %c0_i32_1 : i32, i32, i32, i32
  }
  func.func @transform_1(%arg0: i32, %arg1: i32) -> (i32, i32, i32) {
    %c0_i32 = arith.constant 0 : i32
    %c0_i32_0 = arith.constant 0 : i32
    %c0_i32_1 = arith.constant 0 : i32
    %c0_i32_2 = arith.constant 0 : i32
    return %c0_i32, %c0_i32_0, %c0_i32_1 : i32, i32, i32
  }
  func.func @transform_2(%arg0: i32, %arg1: i32) -> (i32, i32) {
    %c0_i32 = arith.constant 0 : i32
    %c0_i32_0 = arith.constant 0 : i32
    %c0_i32_1 = arith.constant 0 : i32
    return %c0_i32, %c0_i32_0 : i32, i32
  }
  func.func @transform_3(%arg0: i32, %arg1: i32) -> (i32, i32, i32) {
    %c0_i32 = arith.constant 0 : i32
    %c0_i32_0 = arith.constant 0 : i32
    return %arg0, %arg1, %c0_i32 : i32, i32, i32
  }
}

module attributes {stable_mosaic.version = 11 : i64} {
  func.func @_conv_bn_act_kernel(%arg0: i32, %arg1: i32, %arg2: memref<1x10x10x128xbf16, #tpu.memory_space<vmem>>, %arg3: memref<9x128x128xbf16, #tpu.memory_space<vmem>>, %arg4: memref<1x128xf32, #tpu.memory_space<vmem>>, %arg5: memref<1x64x128xbf16, #tpu.memory_space<vmem>>, %arg6: memref<1x64x128xf32, #tpu.memory_space<vmem>>) attributes {dimension_semantics = [#tpu.dimension_semantics<parallel>, #tpu.dimension_semantics<parallel>], iteration_bounds = array<i64: 2, 1>, scalar_prefetch = 0 : i64, scratch_operands = 0 : i64, tpu.core_type = #tpu.core_type<tc>, window_params = [{transform_indices = @transform_0, window_bounds = array<i64: 1, 10, 10, 128>}, {pipeline_mode = #tpu.pipeline_mode<synchronous>, transform_indices = @transform_1, window_bounds = array<i64: 9, 128, 128>}, {pipeline_mode = #tpu.pipeline_mode<synchronous>, transform_indices = @transform_2, window_bounds = array<i64: 1, 128>}, {transform_indices = @transform_3, window_bounds = array<i64: 1, 64, 128>}, {transform_indices = @transform_4, window_bounds = array<i64: 1, 64, 128>}]} {
    %c8_i32 = arith.constant 8 : i32
    %0 = arith.muli %arg1, %c8_i32 : i32
    %c0_i32 = arith.constant 0 : i32
    %1 = arith.addi %0, %c0_i32 : i32
    %c0 = arith.constant 0 : index
    %2 = arith.index_cast %1 : i32 to index
    %c0_0 = arith.constant 0 : index
    %c0_1 = arith.constant 0 : index
    %3 = vector.load %arg2[%c0, %2, %c0_0, %c0_1] : memref<1x10x10x128xbf16, #tpu.memory_space<vmem>>, vector<1x8x8x128xbf16>
    %4 = vector.shape_cast %3 : vector<1x8x8x128xbf16> to vector<8x8x128xbf16>
    %5 = vector.shape_cast %4 : vector<8x8x128xbf16> to vector<64x128xbf16>
    %c0_2 = arith.constant 0 : index
    %c0_3 = arith.constant 0 : index
    %c0_4 = arith.constant 0 : index
    %6 = vector.load %arg3[%c0_2, %c0_3, %c0_4] : memref<9x128x128xbf16, #tpu.memory_space<vmem>>, vector<1x128x128xbf16>
    %7 = vector.shape_cast %6 : vector<1x128x128xbf16> to vector<128x128xbf16>
    %cst = arith.constant dense<0.000000e+00> : vector<64x128xf32>
    %8 = tpu.matmul %5, %7, %cst {dimension_numbers = #tpu.dot_dimension_numbers<[1], [0], [0], [1], [0, 0, 1, 1], [], []>} : vector<64x128xbf16>, vector<128x128xbf16>, vector<64x128xf32> -> vector<64x128xf32>
    %c0_i32_5 = arith.constant 0 : i32
    %9 = arith.addi %0, %c0_i32_5 : i32
    %c0_6 = arith.constant 0 : index
    %10 = arith.index_cast %9 : i32 to index
    %c1 = arith.constant 1 : index
    %c0_7 = arith.constant 0 : index
    %11 = vector.load %arg2[%c0_6, %10, %c1, %c0_7] : memref<1x10x10x128xbf16, #tpu.memory_space<vmem>>, vector<1x8x8x128xbf16>
    %12 = vector.shape_cast %11 : vector<1x8x8x128xbf16> to vector<8x8x128xbf16>
    %13 = vector.shape_cast %12 : vector<8x8x128xbf16> to vector<64x128xbf16>
    %c1_8 = arith.constant 1 : index
    %c0_9 = arith.constant 0 : index
    %c0_10 = arith.constant 0 : index
    %14 = vector.load %arg3[%c1_8, %c0_9, %c0_10] : memref<9x128x128xbf16, #tpu.memory_space<vmem>>, vector<1x128x128xbf16>
    %15 = vector.shape_cast %14 : vector<1x128x128xbf16> to vector<128x128xbf16>
    %cst_11 = arith.constant dense<0.000000e+00> : vector<64x128xf32>
    %16 = tpu.matmul %13, %15, %cst_11 {dimension_numbers = #tpu.dot_dimension_numbers<[1], [0], [0], [1], [0, 0, 1, 1], [], []>} : vector<64x128xbf16>, vector<128x128xbf16>, vector<64x128xf32> -> vector<64x128xf32>
    %17 = arith.addf %8, %16 : vector<64x128xf32>
    %c0_i32_12 = arith.constant 0 : i32
    %18 = arith.addi %0, %c0_i32_12 : i32
    %c0_13 = arith.constant 0 : index
    %19 = arith.index_cast %18 : i32 to index
    %c2 = arith.constant 2 : index
    %c0_14 = arith.constant 0 : index
    %20 = vector.load %arg2[%c0_13, %19, %c2, %c0_14] : memref<1x10x10x128xbf16, #tpu.memory_space<vmem>>, vector<1x8x8x128xbf16>
    %21 = vector.shape_cast %20 : vector<1x8x8x128xbf16> to vector<8x8x128xbf16>
    %22 = vector.shape_cast %21 : vector<8x8x128xbf16> to vector<64x128xbf16>
    %c2_15 = arith.constant 2 : index
    %c0_16 = arith.constant 0 : index
    %c0_17 = arith.constant 0 : index
    %23 = vector.load %arg3[%c2_15, %c0_16, %c0_17] : memref<9x128x128xbf16, #tpu.memory_space<vmem>>, vector<1x128x128xbf16>
    %24 = vector.shape_cast %23 : vector<1x128x128xbf16> to vector<128x128xbf16>
    %cst_18 = arith.constant dense<0.000000e+00> : vector<64x128xf32>
    %25 = tpu.matmul %22, %24, %cst_18 {dimension_numbers = #tpu.dot_dimension_numbers<[1], [0], [0], [1], [0, 0, 1, 1], [], []>} : vector<64x128xbf16>, vector<128x128xbf16>, vector<64x128xf32> -> vector<64x128xf32>
    %26 = arith.addf %17, %25 : vector<64x128xf32>
    %c1_i32 = arith.constant 1 : i32
    %27 = arith.addi %0, %c1_i32 : i32
    %c0_19 = arith.constant 0 : index
    %28 = arith.index_cast %27 : i32 to index
    %c0_20 = arith.constant 0 : index
    %c0_21 = arith.constant 0 : index
    %29 = vector.load %arg2[%c0_19, %28, %c0_20, %c0_21] : memref<1x10x10x128xbf16, #tpu.memory_space<vmem>>, vector<1x8x8x128xbf16>
    %30 = vector.shape_cast %29 : vector<1x8x8x128xbf16> to vector<8x8x128xbf16>
    %31 = vector.shape_cast %30 : vector<8x8x128xbf16> to vector<64x128xbf16>
    %c3 = arith.constant 3 : index
    %c0_22 = arith.constant 0 : index
    %c0_23 = arith.constant 0 : index
    %32 = vector.load %arg3[%c3, %c0_22, %c0_23] : memref<9x128x128xbf16, #tpu.memory_space<vmem>>, vector<1x128x128xbf16>
    %33 = vector.shape_cast %32 : vector<1x128x128xbf16> to vector<128x128xbf16>
    %cst_24 = arith.constant dense<0.000000e+00> : vector<64x128xf32>
    %34 = tpu.matmul %31, %33, %cst_24 {dimension_numbers = #tpu.dot_dimension_numbers<[1], [0], [0], [1], [0, 0, 1, 1], [], []>} : vector<64x128xbf16>, vector<128x128xbf16>, vector<64x128xf32> -> vector<64x128xf32>
    %35 = arith.addf %26, %34 : vector<64x128xf32>
    %c1_i32_25 = arith.constant 1 : i32
    %36 = arith.addi %0, %c1_i32_25 : i32
    %c0_26 = arith.constant 0 : index
    %37 = arith.index_cast %36 : i32 to index
    %c1_27 = arith.constant 1 : index
    %c0_28 = arith.constant 0 : index
    %38 = vector.load %arg2[%c0_26, %37, %c1_27, %c0_28] : memref<1x10x10x128xbf16, #tpu.memory_space<vmem>>, vector<1x8x8x128xbf16>
    %39 = vector.shape_cast %38 : vector<1x8x8x128xbf16> to vector<8x8x128xbf16>
    %40 = vector.shape_cast %39 : vector<8x8x128xbf16> to vector<64x128xbf16>
    %c4 = arith.constant 4 : index
    %c0_29 = arith.constant 0 : index
    %c0_30 = arith.constant 0 : index
    %41 = vector.load %arg3[%c4, %c0_29, %c0_30] : memref<9x128x128xbf16, #tpu.memory_space<vmem>>, vector<1x128x128xbf16>
    %42 = vector.shape_cast %41 : vector<1x128x128xbf16> to vector<128x128xbf16>
    %cst_31 = arith.constant dense<0.000000e+00> : vector<64x128xf32>
    %43 = tpu.matmul %40, %42, %cst_31 {dimension_numbers = #tpu.dot_dimension_numbers<[1], [0], [0], [1], [0, 0, 1, 1], [], []>} : vector<64x128xbf16>, vector<128x128xbf16>, vector<64x128xf32> -> vector<64x128xf32>
    %44 = arith.addf %35, %43 : vector<64x128xf32>
    %c1_i32_32 = arith.constant 1 : i32
    %45 = arith.addi %0, %c1_i32_32 : i32
    %c0_33 = arith.constant 0 : index
    %46 = arith.index_cast %45 : i32 to index
    %c2_34 = arith.constant 2 : index
    %c0_35 = arith.constant 0 : index
    %47 = vector.load %arg2[%c0_33, %46, %c2_34, %c0_35] : memref<1x10x10x128xbf16, #tpu.memory_space<vmem>>, vector<1x8x8x128xbf16>
    %48 = vector.shape_cast %47 : vector<1x8x8x128xbf16> to vector<8x8x128xbf16>
    %49 = vector.shape_cast %48 : vector<8x8x128xbf16> to vector<64x128xbf16>
    %c5 = arith.constant 5 : index
    %c0_36 = arith.constant 0 : index
    %c0_37 = arith.constant 0 : index
    %50 = vector.load %arg3[%c5, %c0_36, %c0_37] : memref<9x128x128xbf16, #tpu.memory_space<vmem>>, vector<1x128x128xbf16>
    %51 = vector.shape_cast %50 : vector<1x128x128xbf16> to vector<128x128xbf16>
    %cst_38 = arith.constant dense<0.000000e+00> : vector<64x128xf32>
    %52 = tpu.matmul %49, %51, %cst_38 {dimension_numbers = #tpu.dot_dimension_numbers<[1], [0], [0], [1], [0, 0, 1, 1], [], []>} : vector<64x128xbf16>, vector<128x128xbf16>, vector<64x128xf32> -> vector<64x128xf32>
    %53 = arith.addf %44, %52 : vector<64x128xf32>
    %c2_i32 = arith.constant 2 : i32
    %54 = arith.addi %0, %c2_i32 : i32
    %c0_39 = arith.constant 0 : index
    %55 = arith.index_cast %54 : i32 to index
    %c0_40 = arith.constant 0 : index
    %c0_41 = arith.constant 0 : index
    %56 = vector.load %arg2[%c0_39, %55, %c0_40, %c0_41] : memref<1x10x10x128xbf16, #tpu.memory_space<vmem>>, vector<1x8x8x128xbf16>
    %57 = vector.shape_cast %56 : vector<1x8x8x128xbf16> to vector<8x8x128xbf16>
    %58 = vector.shape_cast %57 : vector<8x8x128xbf16> to vector<64x128xbf16>
    %c6 = arith.constant 6 : index
    %c0_42 = arith.constant 0 : index
    %c0_43 = arith.constant 0 : index
    %59 = vector.load %arg3[%c6, %c0_42, %c0_43] : memref<9x128x128xbf16, #tpu.memory_space<vmem>>, vector<1x128x128xbf16>
    %60 = vector.shape_cast %59 : vector<1x128x128xbf16> to vector<128x128xbf16>
    %cst_44 = arith.constant dense<0.000000e+00> : vector<64x128xf32>
    %61 = tpu.matmul %58, %60, %cst_44 {dimension_numbers = #tpu.dot_dimension_numbers<[1], [0], [0], [1], [0, 0, 1, 1], [], []>} : vector<64x128xbf16>, vector<128x128xbf16>, vector<64x128xf32> -> vector<64x128xf32>
    %62 = arith.addf %53, %61 : vector<64x128xf32>
    %c2_i32_45 = arith.constant 2 : i32
    %63 = arith.addi %0, %c2_i32_45 : i32
    %c0_46 = arith.constant 0 : index
    %64 = arith.index_cast %63 : i32 to index
    %c1_47 = arith.constant 1 : index
    %c0_48 = arith.constant 0 : index
    %65 = vector.load %arg2[%c0_46, %64, %c1_47, %c0_48] : memref<1x10x10x128xbf16, #tpu.memory_space<vmem>>, vector<1x8x8x128xbf16>
    %66 = vector.shape_cast %65 : vector<1x8x8x128xbf16> to vector<8x8x128xbf16>
    %67 = vector.shape_cast %66 : vector<8x8x128xbf16> to vector<64x128xbf16>
    %c7 = arith.constant 7 : index
    %c0_49 = arith.constant 0 : index
    %c0_50 = arith.constant 0 : index
    %68 = vector.load %arg3[%c7, %c0_49, %c0_50] : memref<9x128x128xbf16, #tpu.memory_space<vmem>>, vector<1x128x128xbf16>
    %69 = vector.shape_cast %68 : vector<1x128x128xbf16> to vector<128x128xbf16>
    %cst_51 = arith.constant dense<0.000000e+00> : vector<64x128xf32>
    %70 = tpu.matmul %67, %69, %cst_51 {dimension_numbers = #tpu.dot_dimension_numbers<[1], [0], [0], [1], [0, 0, 1, 1], [], []>} : vector<64x128xbf16>, vector<128x128xbf16>, vector<64x128xf32> -> vector<64x128xf32>
    %71 = arith.addf %62, %70 : vector<64x128xf32>
    %c2_i32_52 = arith.constant 2 : i32
    %72 = arith.addi %0, %c2_i32_52 : i32
    %c0_53 = arith.constant 0 : index
    %73 = arith.index_cast %72 : i32 to index
    %c2_54 = arith.constant 2 : index
    %c0_55 = arith.constant 0 : index
    %74 = vector.load %arg2[%c0_53, %73, %c2_54, %c0_55] : memref<1x10x10x128xbf16, #tpu.memory_space<vmem>>, vector<1x8x8x128xbf16>
    %75 = vector.shape_cast %74 : vector<1x8x8x128xbf16> to vector<8x8x128xbf16>
    %76 = vector.shape_cast %75 : vector<8x8x128xbf16> to vector<64x128xbf16>
    %c8 = arith.constant 8 : index
    %c0_56 = arith.constant 0 : index
    %c0_57 = arith.constant 0 : index
    %77 = vector.load %arg3[%c8, %c0_56, %c0_57] : memref<9x128x128xbf16, #tpu.memory_space<vmem>>, vector<1x128x128xbf16>
    %78 = vector.shape_cast %77 : vector<1x128x128xbf16> to vector<128x128xbf16>
    %cst_58 = arith.constant dense<0.000000e+00> : vector<64x128xf32>
    %79 = tpu.matmul %76, %78, %cst_58 {dimension_numbers = #tpu.dot_dimension_numbers<[1], [0], [0], [1], [0, 0, 1, 1], [], []>} : vector<64x128xbf16>, vector<128x128xbf16>, vector<64x128xf32> -> vector<64x128xf32>
    %80 = arith.addf %71, %79 : vector<64x128xf32>
    %c0_59 = arith.constant 0 : index
    %c0_60 = arith.constant 0 : index
    %81 = vector.load %arg4[%c0_59, %c0_60] : memref<1x128xf32, #tpu.memory_space<vmem>>, vector<1x128xf32>
    %82 = vector.broadcast %81 : vector<1x128xf32> to vector<64x128xf32>
    %83 = arith.addf %80, %82 : vector<64x128xf32>
    %c0_61 = arith.constant 0 : index
    %c0_62 = arith.constant 0 : index
    %c0_63 = arith.constant 0 : index
    %84 = vector.load %arg5[%c0_61, %c0_62, %c0_63] : memref<1x64x128xbf16, #tpu.memory_space<vmem>>, vector<1x64x128xbf16>
    %85 = vector.shape_cast %84 : vector<1x64x128xbf16> to vector<64x128xbf16>
    %86 = arith.extf %85 : vector<64x128xbf16> to vector<64x128xf32>
    %87 = arith.addf %83, %86 : vector<64x128xf32>
    %cst_64 = arith.constant 0.000000e+00 : f32
    %88 = vector.broadcast %cst_64 : f32 to vector<64x128xf32>
    %89 = arith.maximumf %87, %88 : vector<64x128xf32>
    %c0_65 = arith.constant 0 : index
    %c0_66 = arith.constant 0 : index
    %c0_67 = arith.constant 0 : index
    %90 = vector.load %arg6[%c0_65, %c0_66, %c0_67] : memref<1x64x128xf32, #tpu.memory_space<vmem>>, vector<1x64x128xf32>
    %91 = vector.shape_cast %90 : vector<1x64x128xf32> to vector<64x128xf32>
    %92 = vector.shape_cast %89 : vector<64x128xf32> to vector<1x64x128xf32>
    tpu.vector_store %arg6[%c0_65, %c0_66, %c0_67], %92 {strides = array<i32>} : memref<1x64x128xf32, #tpu.memory_space<vmem>>, vector<1x64x128xf32>,
    return
  }
  func.func @transform_0(%arg0: i32, %arg1: i32) -> (i32, i32, i32, i32) {
    %c0_i32 = arith.constant 0 : i32
    %c0_i32_0 = arith.constant 0 : i32
    %c0_i32_1 = arith.constant 0 : i32
    %c0_i32_2 = arith.constant 0 : i32
    return %arg0, %c0_i32, %c0_i32_0, %c0_i32_1 : i32, i32, i32, i32
  }
  func.func @transform_1(%arg0: i32, %arg1: i32) -> (i32, i32, i32) {
    %c0_i32 = arith.constant 0 : i32
    %c0_i32_0 = arith.constant 0 : i32
    %c0_i32_1 = arith.constant 0 : i32
    %c0_i32_2 = arith.constant 0 : i32
    return %c0_i32, %c0_i32_0, %c0_i32_1 : i32, i32, i32
  }
  func.func @transform_2(%arg0: i32, %arg1: i32) -> (i32, i32) {
    %c0_i32 = arith.constant 0 : i32
    %c0_i32_0 = arith.constant 0 : i32
    %c0_i32_1 = arith.constant 0 : i32
    return %c0_i32, %c0_i32_0 : i32, i32
  }
  func.func @transform_3(%arg0: i32, %arg1: i32) -> (i32, i32, i32) {
    %c0_i32 = arith.constant 0 : i32
    %c0_i32_0 = arith.constant 0 : i32
    return %arg0, %arg1, %c0_i32 : i32, i32, i32
  }
  func.func @transform_4(%arg0: i32, %arg1: i32) -> (i32, i32, i32) {
    %c0_i32 = arith.constant 0 : i32
    %c0_i32_0 = arith.constant 0 : i32
    return %arg0, %arg1, %c0_i32 : i32, i32, i32
  }
}

</mosaic_0001>

<bundles_post_ra>
// kernel: basic_block_forward.4
= control target key start
LH: loop header
LB: loop body
LE: loop exit
PB: predicated region body
PF: predicated region fallthrough
CT: control target
= control target key end

     0   :  { %s508_s12 = smov 0   ;;  %s510_s13 = smov 0   ;;  %s547_s0 = inlined_call_operand.vmem [shape: bf16[2,8,8,4], index: 0, kind: input, shape index: {}]   ;;  %s548_s1 = inlined_call_operand.vmem [shape: bf16[1,4,128], index: 1, kind: input, shape index: {}]   ;;  %s549_s2 = inlined_call_operand.vmem [shape: f32[1,128], index: 2, kind: input, shape index: {}]   ;;  %s550_s3 = inlined_call_operand.vmem [shape: bf16[2,64,128], index: 3, kind: output, shape index: {}]  }
   0x1   :  { %s512_s14 = smov 0  }
   0x2 LB: > { %s25_s15 = sadd.s32 1, %s482_s13  ;;  %p380_p0 = scmp.ge.s32.totalorder %s486_s14, 1  ;;  %s486_s14 = sphi %s512_s14, %s13_s14   ;;  %s482_s13 = sphi %s510_s13, %s552_s13   ;;  %s478_s12 = sphi %s508_s12, %s551_s12  }
   0x3   : > { %p27_p1 = scmp.ge.s32.totalorder %s25_s15, 2  ;;  %p151_p2 = scmp.lt.s32.totalorder %s486_s14, 3 }
   0x5   : > { %s554_s15 = smov (%p27_p1, %s25_s15), 0  ;;  %p152_p3 = pnand %p380_p0, %p151_p2 }
   0x6   : > { %p179_p4 = scmp.lt.s32.totalorder (!%p152_p3), %s478_s12, 1 }
   0x7   : > { %155 = sbr.rel (%p152_p3) target bundleno = 164 (0xa4), region = 32 }
   0xc   : > { %v206_v0 = vld [vmem:[%s548_s1] sm:$0x3]  ;;  %vm244_vm0 = vcmask 1041408   ;;  %s556_s12 = smov (!%p179_p4, %s478_s12), 1  ;;  %vm231_vm1 = vcmask 31744  }
   0xd   : > { %v246_v1 = vsel %vm244_vm0, %v206_v0, 0  ;;  %s407_s18 = sshll.u32 %s556_s12, 5  ;;  %v463_v8 = vld [vmem:[%s549_s2] ss:$0 sm:$0xff] }
   0xe   : > { %255 = vmatpush.bf16.msra.mxu0 %v246_v1  ;;  %436 = vmatpush.bf16.msra.mxu1 %v246_v1  ;;  %s183_s21 = scalar_lea.vmem %s547_s0, %s407_s18  ;;  %s192_s26 = scalar_lea.vmem %s550_s3, %s407_s18 }
   0xf   : > { %437 = vmatpush.bf16.msra.mxu2 %v246_v1  ;;  %438 = vmatpush.bf16.msra.mxu3 %v246_v1  ;;  %v409_v2 = vld [vmem:[%s183_s21] sm:$0xff]  ;;  %v410_v3 = vld [vmem:[%s183_s21 + $0x8] sm:$0xff]  ;;  %v411_v4 = vld [vmem:[%s183_s21 + $0x10] sm:$0xff] }
  0x10   : > { %v412_v5 = vld [vmem:[%s183_s21 + $0x18] sm:$0xff] }
  0x11   : > { %401 = vmatmul.msk.bf16.vlgmr.msra.gmra.mxu0 %vm231_vm1, %v409_v2  ;;  %402 = vmatmul.msk.bf16.vlgmr.msra.gmra.mxu1 %vm231_vm1, %v410_v3 }
  0x12   : > { %403 = vmatmul.msk.bf16.vlgmr.msra.gmra.mxu2 %vm231_vm1, %v411_v4  ;;  %404 = vmatmul.msk.bf16.vlgmr.msra.gmra.mxu3 %vm231_vm1, %v412_v5 }
  0x8e   : > { %v257_v6 = vpop.f32.mrf.mxu0  ;;  %v262_v7 = vpop.f32.mrf.mxu1 }
  0x8f   : > { %v258_v13 = vadd.f32 %v463_v8, %v257_v6  ;;  %v263_v14 = vadd.f32 %v463_v8, %v262_v7 }
  0x95   : > { %v267_v9 = vpop.f32.mrf.mxu2  ;;  %v272_v10 = vpop.f32.mrf.mxu3 }
  0x96   : > { %v259_v11 = vpop.f32.mrf.mxu0  ;;  %v264_v12 = vpop.f32.mrf.mxu1  ;;  %v268_v21 = vadd.f32 %v463_v8, %v267_v9  ;;  %v273_v22 = vadd.f32 %v463_v8, %v272_v10 }
  0x97   : > { %v260_v15 = vadd.f32 %v463_v8, %v259_v11  ;;  %v265_v16 = vadd.f32 %v463_v8, %v264_v12 }
  0x99   : > { %v416_v17 = vpack.c.bf16 %v260_v15, %v258_v13  ;;  %v421_v18 = vpack.c.bf16 %v265_v16, %v263_v14 }
  0x9b   : > { %417 = vst [vmem:[%s192_s26] sm:$0xff] %v416_v17  }
  0x9c   : > { %433 = vst [vmem:[%s192_s26 + $0x8] sm:$0xff] %v421_v18  }
  0x9d   : > { %v269_v19 = vpop.f32.mrf.mxu2  ;;  %v274_v20 = vpop.f32.mrf.mxu3 }
  0x9e   : > { %v270_v23 = vadd.f32 %v463_v8, %v269_v19  ;;  %v275_v24 = vadd.f32 %v463_v8, %v274_v20 }
  0xa0   : > { %v426_v25 = vpack.c.bf16 %v270_v23, %v268_v21  ;;  %v431_v26 = vpack.c.bf16 %v275_v24, %v273_v22 }
  0xa2   : > { %434 = vst [vmem:[%s192_s26 + $0x10] sm:$0xff] %v426_v25  }
  0xa3   : > { %435 = vst [vmem:[%s192_s26 + $0x18] sm:$0xff] %v431_v26  }
  0xa4 PF: > { %s13_s14 = sadd.s32 1, %s486_s14   ;;  %s551_s12 = smov %s482_s13 }
  0xa5   : > { %p10_p5 = scmp.ge.s32.totalorder %s13_s14, 4   ;;  %s552_s13 = smov %s554_s15 }
  0xa7   :  { %12 = sbr.rel (!%p10_p5) target bundleno = 2 (0x2), region = 63 }

// kernel: basic_block_forward.3
= control target key start
LH: loop header
LB: loop body
LE: loop exit
PB: predicated region body
PF: predicated region fallthrough
CT: control target
= control target key end

     0   :  { %s1766_s12 = smov 0   ;;  %s1768_s13 = smov 0   ;;  %s2087_s0 = inlined_call_operand.vmem [shape: bf16[8,9,9,4], index: 0, kind: input, shape index: {}]   ;;  %s2088_s1 = inlined_call_operand.vmem [shape: bf16[9,4,128], index: 1, kind: input, shape index: {}]   ;;  %s2089_s2 = inlined_call_operand.vmem [shape: f32[1,128], index: 2, kind: input, shape index: {}]   ;;  %s2090_s3 = inlined_call_operand.vmem [shape: bf16[2,64,128], index: 3, kind: output, shape index: {}]  }
   0x1   :  { %s1770_s14 = smov 0  }
   0x2 LB: > { %s25_s15 = sadd.s32 1, %s1740_s13  ;;  %p1426_p0 = scmp.ge.s32.totalorder %s1744_s14, 1  ;;  %s1744_s14 = sphi %s1770_s14, %s13_s14   ;;  %s1740_s13 = sphi %s1768_s13, %s2094_s13   ;;  %s1736_s12 = sphi %s1766_s12, %s2093_s12  }
   0x3   : > { %p27_p1 = scmp.ge.s32.totalorder %s25_s15, 2  ;;  %p153_p2 = scmp.lt.s32.totalorder %s1744_s14, 3 }
   0x5   : > { %s2096_s15 = smov (%p27_p1, %s25_s15), 0  ;;  %p154_p3 = pnand %p1426_p0, %p153_p2 }
   0x6   : > { %s1427_s18 = sshll.u32 (!%p154_p3), %s1736_s12, 2  ;;  %p190_p5 = scmp.lt.s32.totalorder (!%p154_p3), %s1736_s12, 1 }
   0x7   : > { %157 = sbr.rel (%p154_p3) target bundleno = 302 (0x12e), region = 32  ;;  %p183_p4 = scmp.lt.s32.totalorder (!%p154_p3), %s1427_s18, 7 }
   0xc   : > { %v1439_v0 = vld [vmem:[%s2088_s1 + $0x2] sm:$0x3]  ;;  %vm259_vm0 = vcmask 1041408   ;;  %v1480_v2 = vld [vmem:[%s2088_s1 + $0x4] sm:$0x3]  ;;  %s2098_s18 = smov (!%p183_p4, %s1427_s18), 7 }
   0xd   : > { %v261_v1 = vsel %vm259_vm0, %v1439_v0, 0  ;;  %v1493_v3 = vld [vmem:[%s2088_s1 + $0x6] sm:$0x3]  ;;  %v514_v4 = vsel %vm259_vm0, %v1480_v2, 0  ;;  %v212_v6 = vld [vmem:[%s2088_s1] sm:$0x3] }
   0xe   : > { %1693 = vmatpush.bf16.msra.mxu1 %v261_v1  ;;  %1694 = vmatpush.bf16.msra.mxu2 %v261_v1  ;;  %v599_v5 = vsel %vm259_vm0, %v1493_v3, 0  ;;  %v1522_v7 = vld [vmem:[%s2088_s1 + $0x8] sm:$0x3]  ;;  %v325_v8 = vsel %vm259_vm0, %v212_v6, 0  ;;  %s1696_s27 = smul.u32 72, %s2098_s18  ;;  %vm246_vm1 = vcmask 31744  }
   0xf   : > { %1695 = vmatpush.bf16.msra.mxu3 %v261_v1  ;;  %270 = vmatpush.bf16.msra.mxu0 %v261_v1  ;;  %v684_v9 = vsel %vm259_vm0, %v1522_v7, 0  ;;  %v1572_v10 = vld [vmem:[%s2088_s1 + $0xc] sm:$0x3]  ;;  %v1601_v11 = vld [vmem:[%s2088_s1 + $0xe] sm:$0x3]  ;;  %s2100_s12 = smov (!%p190_p5, %s1736_s12), 1 }
  0x10   : > { %s1813_s5 = scalar_lea.vmem %s2087_s0, %s1696_s27  ;;  %v1559_v12 = vld [vmem:[%s2088_s1 + $0xa] sm:$0x3]  ;;  %v1638_v13 = vld [vmem:[%s2088_s1 + $0x10] sm:$0x3]  ;;  %v964_v25 = vsel %vm259_vm0, %v1572_v10, 0  ;;  %v1049_v26 = vsel %vm259_vm0, %v1601_v11, 0 }
  0x11   : > { %v1446_v14 = vld [vmem:[%s1813_s5 + $0x58] sm:$0xf]  ;;  %v1651_v15 = vld [vmem:[%s1813_s5 + $0x5c] sm:$0xf0]  ;;  %v1450_v16 = vld [vmem:[%s1813_s5 + $0x68] sm:$0xf] }
  0x12   : > { %523 = vmatpush.bf16.msrb.mxu2 %v514_v4  ;;  %334 = vmatpush.bf16.msrb.mxu1 %v325_v8  ;;  %v1447_v17 = vor.u32 %v1651_v15, %v1446_v14  ;;  %v1652_v18 = vld [vmem:[%s1813_s5 + $0x6c] sm:$0xf0]  ;;  %v1454_v19 = vld [vmem:[%s1813_s5 + $0x78] sm:$0xf]  ;;  %v1653_v20 = vld [vmem:[%s1813_s5 + $0x7c] sm:$0xf0] }
  0x13   : > { %608 = vmatpush.bf16.msrb.mxu3 %v599_v5  ;;  %693 = vmatpush.bf16.msrb.mxu0 %v684_v9  ;;  %v1451_v21 = vor.u32 %v1652_v18, %v1450_v16  ;;  %v1455_v22 = vor.u32 %v1653_v20, %v1454_v19  ;;  %v1442_v23 = vld [vmem:[%s1813_s5 + $0x48] sm:$0xf]  ;;  %v1650_v24 = vld [vmem:[%s1813_s5 + $0x4c] sm:$0xf0]  ;;  %v356_v28 = vld [vmem:[%s1813_s5] sm:$0xf] }
  0x14   : > { %1457 = vmatmul.msk.bf16.vlgmr.msra.gmra.mxu1 %vm246_vm1, %v1447_v17  ;;  %v1443_v27 = vor.u32 %v1650_v24, %v1442_v23  ;;  %v357_v29 = vld [vmem:[%s1813_s5 + $0x4] sm:$0x1]  ;;  %v878_v30 = vsel %vm259_vm0, %v1559_v12, 0  ;;  %v1243_v31 = vsel %vm259_vm0, %v1638_v13, 0  ;;  %v358_v32 = vld [vmem:[%s1813_s5 + $0x8] sm:$0xf] }
  0x15   : > { %1458 = vmatmul.msk.bf16.vlgmr.msra.gmra.mxu2 %vm246_vm1, %v1451_v21  ;;  %1459 = vmatmul.msk.bf16.vlgmr.msra.gmra.mxu3 %vm246_vm1, %v1455_v22  ;;  %v359_v33 = vld [vmem:[%s1813_s5 + $0xc] sm:$0x1]  ;;  %v376_v34 = vshrl.u32 %v356_v28, 16  ;;  %v379_v35 = vshll.u32 %v356_v28, 16  ;;  %v385_v36 = vshll.u32 %v357_v29, 16  ;;  %v390_v37 = vshrl.u32 %v358_v32, 16 }
  0x16   : > { %1456 = vmatmul.msk.bf16.vlgmr.msra.gmra.mxu0 %vm246_vm1, %v1443_v27  ;;  %v393_v38 = vshll.u32 %v358_v32, 16  ;;  %v399_v39 = vshll.u32 %v359_v33, 16  ;;  %973 = vmatpush.bf16.msra.mxu2 %v964_v25  ;;  %vm372_vm2 = vsmask.f32 3328  ;;  %vm373_vm3 = vsmask.f32 7440 }
  0x17   : > { %v378_v40 = vrot.slane %v376_v34, 4  ;;  %v381_v41 = vrot.slane %v379_v35, 5  ;;  %1058 = vmatpush.bf16.msra.mxu3 %v1049_v26  ;;  %887 = vmatpush.bf16.msra.mxu1 %v878_v30  ;;  %v392_v42 = vrot.slane %v390_v37, 4  ;;  %v387_v45 = vrot.slane %v385_v36, 5  ;;  %v360_v46 = vld [vmem:[%s1813_s5 + $0x10] sm:$0xf]  ;;  %vm1845_vm4 = vmor %vm372_vm2, %vm373_vm3 }
  0x18   : > { %v395_v43 = vrot.slane %v393_v38, 5  ;;  %1252 = vmatpush.bf16.msra.mxu0 %v1243_v31  ;;  %v401_v49 = vrot.slane %v399_v39, 5  ;;  %v362_v50 = vld [vmem:[%s1813_s5 + $0x18] sm:$0xf]  ;;  %v1462_v51 = vld [vmem:[%s1813_s5] sm:$0xf] }
  0x19   : > { %v382_v44 = vor.u32 %v381_v41, %v378_v40  ;;  %v404_v53 = vshrl.u32 %v360_v46, 16  ;;  %v407_v54 = vshll.u32 %v360_v46, 16  ;;  %v1646_v55 = vld [vmem:[%s1813_s5 + $0x4] sm:$0xf0]  ;;  %v418_v57 = vshrl.u32 %v362_v50, 16  ;;  %s1645_s18 = sshll.u32 %s2100_s12, 5 }
  0x1a   : > { %v396_v48 = vor.u32 %v395_v43, %v392_v42  ;;  %v421_v58 = vshll.u32 %v362_v50, 16  ;;  %v1496_v60 = vld [vmem:[%s1813_s5 + $0x90] sm:$0xf]  ;;  %v1654_v61 = vld [vmem:[%s1813_s5 + $0x94] sm:$0xf0]  ;;  %v1463_v9 = vor.u32 %v1646_v55, %v1462_v51  ;;  %s2053_s21 = scalar_lea.vmem %s2090_s3, %s1645_s18 }
  0x1b   : > { %v383_v52 = vrot.slane %v382_v44, 4  ;;  %v406_v62 = vrot.slane %v404_v53, 4  ;;  %v409_v63 = vrot.slane %v407_v54, 5  ;;  %v1525_v2 = vld [vmem:[%s1813_s5 + $0xd8] sm:$0xf]  ;;  %v420_v4 = vrot.slane %v418_v57, 4 }
  0x1c   : > { %v397_v56 = vrot.slane %v396_v48, 4  ;;  %v1658_v3 = vld [vmem:[%s1813_s5 + $0xdc] sm:$0xf0]  ;;  %v423_v5 = vrot.slane %v421_v58, 5  ;;  %v361_v7 = vld [vmem:[%s1813_s5 + $0x14] sm:$0x1]  ;;  %v1497_v11 = vor.u32 %v1654_v61, %v1496_v60 }
  0x1d   : > { %v388_v59 = vsel %vm1845_vm4, %v383_v52, %v387_v45  ;;  %v363_v8 = vld [vmem:[%s1813_s5 + $0x1c] sm:$0x1]  ;;  %v1526_v12 = vor.u32 %v1658_v3, %v1525_v2  ;;  %v410_v13 = vor.u32 %v409_v63, %v406_v62  ;;  %v413_v14 = vshll.u32 %v361_v7, 16  ;;  %v364_v21 = vld [vmem:[%s1813_s5 + $0x20] sm:$0xf] }
  0x1e   : > { %v402_v0 = vsel %vm1845_vm4, %v397_v56, %v401_v49  ;;  %v489_v1 = vunpack.c.l.b16 %v388_v59  ;;  %v424_v15 = vor.u32 %v423_v5, %v420_v4  ;;  %v427_v16 = vshll.u32 %v363_v8, 16  ;;  %v366_v22 = vld [vmem:[%s1813_s5 + $0x28] sm:$0xf]  ;;  %v1466_v29 = vld [vmem:[%s1813_s5 + $0x10] sm:$0xf] }
  0x1f   : > { %v490_v6 = vunpack.c.l.b16 %v402_v0  ;;  %v411_v17 = vrot.slane %v410_v13, 4  ;;  %v415_v18 = vrot.slane %v413_v14, 5  ;;  %v432_v23 = vshrl.u32 %v364_v21, 16  ;;  %v1647_v30 = vld [vmem:[%s1813_s5 + $0x14] sm:$0xf0] }
  0x20   : > { %v425_v19 = vrot.slane %v424_v15, 4  ;;  %v429_v20 = vrot.slane %v427_v16, 5  ;;  %v435_v24 = vshll.u32 %v364_v21, 16  ;;  %v446_v27 = vshrl.u32 %v366_v22, 16  ;;  %v1500_v33 = vld [vmem:[%s1813_s5 + $0xa0] sm:$0xf] }
  0x21   : > { %v497_v10 = vpack.c.b16 %v490_v6, %v489_v1  ;;  %v416_v25 = vsel %vm1845_vm4, %v411_v17, %v415_v18  ;;  %v449_v28 = vshll.u32 %v366_v22, 16  ;;  %v1655_v34 = vld [vmem:[%s1813_s5 + $0xa4] sm:$0xf0]  ;;  %v1659_v36 = vld [vmem:[%s1813_s5 + $0xec] sm:$0xf0]  ;;  %v434_v37 = vrot.slane %v432_v23, 4 }
  0x22   : > { %v430_v26 = vsel %vm1845_vm4, %v425_v19, %v429_v20  ;;  %v491_v31 = vunpack.c.l.b16 %v416_v25  ;;  %v1529_v35 = vld [vmem:[%s1813_s5 + $0xe8] sm:$0xf]  ;;  %v437_v38 = vrot.slane %v435_v24, 5  ;;  %v448_v39 = vrot.slane %v446_v27, 4  ;;  %v365_v41 = vld [vmem:[%s1813_s5 + $0x24] sm:$0x1] }
  0x23   : > { %v492_v32 = vunpack.c.l.b16 %v430_v26  ;;  %v451_v40 = vrot.slane %v449_v28, 5  ;;  %v367_v42 = vld [vmem:[%s1813_s5 + $0x2c] sm:$0x1]  ;;  %v1467_v43 = vor.u32 %v1647_v30, %v1466_v29  ;;  %v1501_v45 = vor.u32 %v1655_v34, %v1500_v33  ;;  %v368_v52 = vld [vmem:[%s1813_s5 + $0x30] sm:$0xf] }
  0x24   : > { %1476 = vmatmul.msk.bf16.vlgmr.msrb.gmra.mxu1 %vm246_vm1, %v1463_v9  ;;  %v1530_v46 = vor.u32 %v1659_v36, %v1529_v35  ;;  %v438_v48 = vor.u32 %v437_v38, %v434_v37  ;;  %v441_v49 = vshll.u32 %v365_v41, 16  ;;  %v455_v51 = vshll.u32 %v367_v42, 16  ;;  %v370_v53 = vld [vmem:[%s1813_s5 + $0x38] sm:$0xf]  ;;  %v369_v4 = vld [vmem:[%s1813_s5 + $0x34] sm:$0x1] }
  0x25   : > { %1481 = vmatmul.msk.bf16.vlgmr.msrb.gmra.mxu2 %vm246_vm1, %v497_v10  ;;  %1510 = vmatmul.msk.bf16.vlgmr.msrb.gmra.mxu3 %vm246_vm1, %v1497_v11  ;;  %v498_v44 = vpack.c.b16 %v492_v32, %v491_v31  ;;  %v452_v50 = vor.u32 %v451_v40, %v448_v39  ;;  %v460_v58 = vshrl.u32 %v368_v52, 16  ;;  %v463_v59 = vshll.u32 %v368_v52, 16  ;;  %v371_v5 = vld [vmem:[%s1813_s5 + $0x3c] sm:$0x1]  ;;  %v1470_v6 = vld [vmem:[%s1813_s5 + $0x20] sm:$0xf] }
  0x26   : > { %1539 = vmatmul.msk.bf16.vlgmr.msrb.gmra.mxu0 %vm246_vm1, %v1526_v12  ;;  %v439_v54 = vrot.slane %v438_v48, 4  ;;  %v443_v55 = vrot.slane %v441_v49, 5  ;;  %v457_v57 = vrot.slane %v455_v51, 5  ;;  %v474_v60 = vshrl.u32 %v370_v53, 16  ;;  %v1648_v7 = vld [vmem:[%s1813_s5 + $0x24] sm:$0xf0] }
  0x27   : > { %v453_v56 = vrot.slane %v452_v50, 4  ;;  %v477_v61 = vshll.u32 %v370_v53, 16  ;;  %v462_v0 = vrot.slane %v460_v58, 4  ;;  %v465_v1 = vrot.slane %v463_v59, 5  ;;  %v1504_v10 = vld [vmem:[%s1813_s5 + $0xb0] sm:$0xf] }
  0x28   : > { %v444_v62 = vsel %vm1845_vm4, %v439_v54, %v443_v55  ;;  %v476_v2 = vrot.slane %v474_v60, 4  ;;  %v1656_v11 = vld [vmem:[%s1813_s5 + $0xb4] sm:$0xf0]  ;;  %v1660_v13 = vld [vmem:[%s1813_s5 + $0xfc] sm:$0xf0]  ;;  %v469_v15 = vshll.u32 %v369_v4, 16  ;;  %v1471_v18 = vor.u32 %v1648_v7, %v1470_v6 }
  0x29   : > { %v458_v63 = vsel %vm1845_vm4, %v453_v56, %v457_v57  ;;  %v479_v3 = vrot.slane %v477_v61, 5  ;;  %v493_v8 = vunpack.c.l.b16 %v444_v62  ;;  %v1533_v12 = vld [vmem:[%s1813_s5 + $0xf8] sm:$0xf]  ;;  %v466_v14 = vor.u32 %v465_v1, %v462_v0  ;;  %v1543_v26 = vld [vmem:[%s1813_s5 + $0x90] sm:$0xf] }
  0x2a   : > { %v494_v9 = vunpack.c.l.b16 %v458_v63  ;;  %v483_v17 = vshll.u32 %v371_v5, 16  ;;  %v1505_v20 = vor.u32 %v1656_v11, %v1504_v10  ;;  %v1534_v21 = vor.u32 %v1660_v13, %v1533_v12  ;;  %v1545_v27 = vld [vmem:[%s1813_s5 + $0x98] sm:$0xf]  ;;  %v1622_v28 = vld [vmem:[%s1813_s5 + $0x8] sm:$0xf] }
  0x2b   : > { %v480_v16 = vor.u32 %v479_v3, %v476_v2  ;;  %v467_v22 = vrot.slane %v466_v14, 4  ;;  %v471_v23 = vrot.slane %v469_v15, 5  ;;  %v1624_v29 = vld [vmem:[%s1813_s5 + $0x10] sm:$0xf]  ;;  %v740_v32 = vshrl.u32 %v1543_v26, 16 }
  0x2c   : > { %v499_v19 = vpack.c.b16 %v494_v9, %v493_v8  ;;  %v485_v25 = vrot.slane %v483_v17, 5  ;;  %v743_v33 = vshll.u32 %v1543_v26, 16  ;;  %v754_v34 = vshrl.u32 %v1545_v27, 16  ;;  %v1474_v40 = vld [vmem:[%s1813_s5 + $0x30] sm:$0xf] }
  0x2d   : > { %v481_v24 = vrot.slane %v480_v16, 4  ;;  %v472_v30 = vsel %vm1845_vm4, %v467_v22, %v471_v23  ;;  %v757_v35 = vshll.u32 %v1545_v27, 16  ;;  %v1105_v36 = vshrl.u32 %v1622_v28, 16  ;;  %v1649_v41 = vld [vmem:[%s1813_s5 + $0x34] sm:$0xf0] }
  0x2e   : > { %v1108_v37 = vshll.u32 %v1622_v28, 16  ;;  %v1119_v38 = vshrl.u32 %v1624_v29, 16  ;;  %v1122_v39 = vshll.u32 %v1624_v29, 16  ;;  %v495_v42 = vunpack.c.l.b16 %v472_v30  ;;  %v1546_v52 = vld [vmem:[%s1813_s5 + $0x9c] sm:$0x1] }
  0x2f   : > { %v486_v31 = vsel %vm1845_vm4, %v481_v24, %v485_v25  ;;  %v742_v48 = vrot.slane %v740_v32, 4  ;;  %v745_v49 = vrot.slane %v743_v33, 5  ;;  %v756_v50 = vrot.slane %v754_v34, 4  ;;  %v1623_v57 = vld [vmem:[%s1813_s5 + $0xc] sm:$0x1] }
  0x30   : > { %v759_v51 = vrot.slane %v757_v35, 5  ;;  %v1107_v53 = vrot.slane %v1105_v36, 4  ;;  %v1110_v54 = vrot.slane %v1108_v37, 5  ;;  %v1121_v55 = vrot.slane %v1119_v38, 4  ;;  %v1625_v58 = vld [vmem:[%s1813_s5 + $0x14] sm:$0x1] }
  0x31   : > { %v1124_v56 = vrot.slane %v1122_v39, 5  ;;  %v1475_v59 = vor.u32 %v1649_v41, %v1474_v40  ;;  %v1537_v62 = vld [vmem:[%s1813_s5 + $0x108] sm:$0xf]  ;;  %v1661_v63 = vld [vmem:[%s1813_s5 + $0x10c] sm:$0xf0]  ;;  %v746_v0 = vor.u32 %v745_v49, %v742_v48  ;;  %v763_v3 = vshll.u32 %v1546_v52, 16 }
  0x32   : > { %v760_v2 = vor.u32 %v759_v51, %v756_v50  ;;  %v1111_v4 = vor.u32 %v1110_v54, %v1107_v53  ;;  %v1114_v5 = vshll.u32 %v1623_v57, 16  ;;  %v1128_v7 = vshll.u32 %v1625_v58, 16  ;;  %v1547_v9 = vld [vmem:[%s1813_s5 + $0xa0] sm:$0xf]  ;;  %v1549_v10 = vld [vmem:[%s1813_s5 + $0xa8] sm:$0xf] }
  0x33   : > { %v1125_v6 = vor.u32 %v1124_v56, %v1121_v55  ;;  %v1538_v8 = vor.u32 %v1661_v63, %v1537_v62  ;;  %v747_v11 = vrot.slane %v746_v0, 4  ;;  %v765_v14 = vrot.slane %v763_v3, 5  ;;  %v1626_v23 = vld [vmem:[%s1813_s5 + $0x18] sm:$0xf]  ;;  %v1628_v24 = vld [vmem:[%s1813_s5 + $0x20] sm:$0xf] }
  0x34   : > { %1477 = vmatmul.msk.bf16.gmra.mxu1 %vm246_vm1, %v1467_v43  ;;  %v496_v43 = vunpack.c.l.b16 %v486_v31  ;;  %v761_v13 = vrot.slane %v760_v2, 4  ;;  %v1112_v15 = vrot.slane %v1111_v4, 4  ;;  %v1116_v16 = vrot.slane %v1114_v5, 5  ;;  %v1548_v29 = vld [vmem:[%s1813_s5 + $0xa4] sm:$0x1] }
  0x35   : > { %1482 = vmatmul.msk.bf16.gmra.mxu2 %vm246_vm1, %v498_v44  ;;  %1511 = vmatmul.msk.bf16.gmra.mxu3 %vm246_vm1, %v1501_v45  ;;  %v1508_v44 = vld [vmem:[%s1813_s5 + $0xc0] sm:$0xf]  ;;  %v1657_v45 = vld [vmem:[%s1813_s5 + $0xc4] sm:$0xf0]  ;;  %v1126_v17 = vrot.slane %v1125_v6, 4  ;;  %v785_v22 = vshll.u32 %v1549_v10, 16 }
  0x36   : > { %1540 = vmatmul.msk.bf16.gmra.mxu0 %vm246_vm1, %v1530_v46  ;;  %v1544_v46 = vld [vmem:[%s1813_s5 + $0x94] sm:$0x1]  ;;  %v500_v60 = vpack.c.b16 %v496_v43, %v495_v42  ;;  %v1509_v61 = vor.u32 %v1657_v45, %v1508_v44  ;;  %v766_v26 = vsel %vm1845_vm4, %v761_v13, %v765_v14  ;;  %v1117_v27 = vsel %vm1845_vm4, %v1112_v15, %v1116_v16  ;;  %v1550_v34 = vld [vmem:[%s1813_s5 + $0xac] sm:$0x1]  ;;  %v1575_v41 = vld [vmem:[%s1813_s5 + $0x8] sm:$0xf] }
  0x37   : > { %v749_v1 = vshll.u32 %v1544_v46, 16  ;;  %v787_v33 = vrot.slane %v785_v22, 5  ;;  %v1133_v35 = vshrl.u32 %v1626_v23, 16  ;;  %v1136_v36 = vshll.u32 %v1626_v23, 16  ;;  %v1662_v42 = vld [vmem:[%s1813_s5 + $0xc] sm:$0xf0] }
  0x38   : > { %v1147_v37 = vshrl.u32 %v1628_v24, 16  ;;  %v1150_v38 = vshll.u32 %v1628_v24, 16  ;;  %v854_v40 = vunpack.c.l.b16 %v766_v26  ;;  %v1218_v43 = vunpack.c.l.b16 %v1117_v27  ;;  %v1604_v45 = vld [vmem:[%s1813_s5 + $0x50] sm:$0xf]  ;;  %v1666_v46 = vld [vmem:[%s1813_s5 + $0x54] sm:$0xf0] }
  0x39   : > { %v751_v12 = vrot.slane %v749_v1, 5  ;;  %v777_v49 = vshll.u32 %v1548_v29, 16  ;;  %v791_v51 = vshll.u32 %v1550_v34, 16  ;;  %v1135_v52 = vrot.slane %v1133_v35, 4  ;;  %v1627_v57 = vld [vmem:[%s1813_s5 + $0x1c] sm:$0x1] }
  0x3a   : > { %v1138_v53 = vrot.slane %v1136_v36, 5  ;;  %v1149_v54 = vrot.slane %v1147_v37, 4  ;;  %v1152_v55 = vrot.slane %v1150_v38, 5  ;;  %v1629_v58 = vld [vmem:[%s1813_s5 + $0x24] sm:$0x1]  ;;  %v1142_v3 = vshll.u32 %v1627_v57, 16 }
  0x3b   : > { %v752_v25 = vsel %vm1845_vm4, %v747_v11, %v751_v12  ;;  %v779_v63 = vrot.slane %v777_v49, 5  ;;  %v793_v1 = vrot.slane %v791_v51, 5  ;;  %v1156_v5 = vshll.u32 %v1629_v58, 16  ;;  %v1551_v6 = vld [vmem:[%s1813_s5 + $0xb0] sm:$0xf] }
  0x3c   : > { %v853_v39 = vunpack.c.l.b16 %v752_v25  ;;  %v1139_v2 = vor.u32 %v1138_v53, %v1135_v52  ;;  %v1153_v4 = vor.u32 %v1152_v55, %v1149_v54  ;;  %v1144_v12 = vrot.slane %v1142_v3, 5  ;;  %v1632_v15 = vld [vmem:[%s1813_s5 + $0x30] sm:$0xf]  ;;  %v1663_v29 = vld [vmem:[%s1813_s5 + $0x1c] sm:$0xf0] }
  0x3d   : > { %v1158_v14 = vrot.slane %v1156_v5, 5  ;;  %v796_v16 = vshrl.u32 %v1551_v6, 16  ;;  %v1175_v22 = vshrl.u32 %v1632_v15, 16  ;;  %v1178_v23 = vshll.u32 %v1632_v15, 16  ;;  %v1552_v35 = vld [vmem:[%s1813_s5 + $0xb4] sm:$0x1] }
  0x3e   : > { %v861_v56 = vpack.c.b16 %v854_v40, %v853_v39  ;;  %v1140_v11 = vrot.slane %v1139_v2, 4  ;;  %v1154_v13 = vrot.slane %v1153_v4, 4  ;;  %v1554_v36 = vld [vmem:[%s1813_s5 + $0xbc] sm:$0x1]  ;;  %v1667_v39 = vld [vmem:[%s1813_s5 + $0x64] sm:$0xf0] }
  0x3f   : > { %v805_v49 = vshll.u32 %v1552_v35, 16  ;;  %v819_v51 = vshll.u32 %v1554_v36, 16  ;;  %v1555_v3 = vld [vmem:[%s1813_s5 + $0xc0] sm:$0xf]  ;;  %v1557_v4 = vld [vmem:[%s1813_s5 + $0xc8] sm:$0xf] }
  0x40   : > { %v1145_v26 = vsel %vm1845_vm4, %v1140_v11, %v1144_v12  ;;  %v1159_v27 = vsel %vm1845_vm4, %v1154_v13, %v1158_v14  ;;  %v838_v11 = vshrl.u32 %v1557_v4, 16  ;;  %v841_v12 = vshll.u32 %v1557_v4, 16  ;;  %v1616_v4 = vld [vmem:[%s1813_s5 + $0x80] sm:$0xf] }
  0x41   : > { %v1220_v40 = vunpack.c.l.b16 %v1145_v26 }
  0x44   : > { %1478 = vmatmul.msk.bf16.gmra.mxu1 %vm246_vm1, %v1471_v18  ;;  %v1130_v18 = vrot.slane %v1128_v7, 5  ;;  %v1553_v7 = vld [vmem:[%s1813_s5 + $0xb8] sm:$0xf] }
  0x45   : > { %1483 = vmatmul.msk.bf16.gmra.mxu2 %vm246_vm1, %v499_v19  ;;  %1512 = vmatmul.msk.bf16.gmra.mxu3 %vm246_vm1, %v1505_v20  ;;  %v768_v19 = vshrl.u32 %v1547_v9, 16  ;;  %v771_v20 = vshll.u32 %v1547_v9, 16 }
  0x46   : > { %1541 = vmatmul.msk.bf16.gmra.mxu0 %vm246_vm1, %v1534_v21  ;;  %v782_v21 = vshrl.u32 %v1549_v10, 16  ;;  %v1131_v28 = vsel %vm1845_vm4, %v1126_v17, %v1130_v18  ;;  %v1630_v10 = vld [vmem:[%s1813_s5 + $0x28] sm:$0xf]  ;;  %v799_v17 = vshll.u32 %v1551_v6, 16  ;;  %v810_v18 = vshrl.u32 %v1553_v7, 16 }
  0x47   : > { %v770_v30 = vrot.slane %v768_v19, 4  ;;  %v773_v31 = vrot.slane %v771_v20, 5  ;;  %v1219_v44 = vunpack.c.l.b16 %v1131_v28  ;;  %v813_v19 = vshll.u32 %v1553_v7, 16  ;;  %v1579_v28 = vld [vmem:[%s1813_s5 + $0x18] sm:$0xf] }
  0x48   : > { %v784_v32 = vrot.slane %v782_v21, 4  ;;  %v1161_v20 = vshrl.u32 %v1630_v10, 16  ;;  %v1164_v21 = vshll.u32 %v1630_v10, 16  ;;  %v1580_v52 = vor.u32 %v1663_v29, %v1579_v28  ;;  %v1634_v7 = vld [vmem:[%s1813_s5 + $0x38] sm:$0xf] }
  0x49   : > { %v774_v48 = vor.u32 %v773_v31, %v770_v30  ;;  %v1608_v30 = vld [vmem:[%s1813_s5 + $0x60] sm:$0xf]  ;;  %v798_v31 = vrot.slane %v796_v16, 4  ;;  %v815_v34 = vrot.slane %v813_v19, 5  ;;  %v827_v10 = vshll.u32 %v1555_v3, 16 }
  0x4a   : > { %v788_v50 = vor.u32 %v787_v33, %v784_v32  ;;  %v801_v32 = vrot.slane %v799_v17, 5  ;;  %v812_v33 = vrot.slane %v810_v18, 4  ;;  %v1163_v37 = vrot.slane %v1161_v20, 4 }
  0x4b   : > { %v775_v62 = vrot.slane %v774_v48, 4  ;;  %v1166_v38 = vrot.slane %v1164_v21, 5  ;;  %v1609_v53 = vor.u32 %v1667_v39, %v1608_v30  ;;  %v1189_v15 = vshrl.u32 %v1634_v7, 16  ;;  %v1583_v21 = vld [vmem:[%s1813_s5 + $0x28] sm:$0xf] }
  0x4c   : > { %v789_v0 = vrot.slane %v788_v50, 4  ;;  %v802_v48 = vor.u32 %v801_v32, %v798_v31  ;;  %v816_v50 = vor.u32 %v815_v34, %v812_v33  ;;  %v1192_v16 = vshll.u32 %v1634_v7, 16  ;;  %v1556_v31 = vld [vmem:[%s1813_s5 + $0xc4] sm:$0x1]  ;;  %v1558_v32 = vld [vmem:[%s1813_s5 + $0xcc] sm:$0x1] }
  0x4d   : > { %v1167_v54 = vor.u32 %v1166_v38, %v1163_v37  ;;  %v829_v26 = vrot.slane %v827_v10, 5  ;;  %v843_v28 = vrot.slane %v841_v12, 5  ;;  %v1191_v33 = vrot.slane %v1189_v15, 4 }
  0x4e   : > { %v794_v9 = vsel %vm1845_vm4, %v789_v0, %v793_v1  ;;  %v1194_v34 = vrot.slane %v1192_v16, 5 }
  0x4f   : > { %v856_v25 = vunpack.c.l.b16 %v794_v9  ;;  %v824_v9 = vshrl.u32 %v1555_v3, 16  ;;  %v1665_v3 = vld [vmem:[%s1813_s5 + $0x3c] sm:$0xf0] }
  0x54   : > { %1479 = vmatmul.msk.bf16.gmra.mxu1 %vm246_vm1, %v1475_v59  ;;  %v1576_v59 = vor.u32 %v1662_v42, %v1575_v41  ;;  %v1221_v41 = vunpack.c.l.b16 %v1159_v27  ;;  %v1631_v42 = vld [vmem:[%s1813_s5 + $0x2c] sm:$0x1]  ;;  %v840_v27 = vrot.slane %v838_v11, 4 }
  0x55   : > { %1484 = vmatmul.msk.bf16.gmra.mxu2 %vm246_vm1, %v500_v60  ;;  %1513 = vmatmul.msk.bf16.gmra.mxu3 %vm246_vm1, %v1509_v61  ;;  %v1605_v60 = vor.u32 %v1666_v46, %v1604_v45  ;;  %v1226_v61 = vpack.c.b16 %v1219_v44, %v1218_v43  ;;  %v1177_v43 = vrot.slane %v1175_v22, 4  ;;  %v1180_v44 = vrot.slane %v1178_v23, 5  ;;  %v1633_v46 = vld [vmem:[%s1813_s5 + $0x34] sm:$0x1]  ;;  %v1664_v22 = vld [vmem:[%s1813_s5 + $0x2c] sm:$0xf0] }
  0x56   : > { %1542 = vmatmul.msk.bf16.gmra.mxu0 %vm246_vm1, %v1538_v8  ;;  %v780_v8 = vsel %vm1845_vm4, %v775_v62, %v779_v63  ;;  %v1170_v55 = vshll.u32 %v1631_v42, 16  ;;  %v1184_v58 = vshll.u32 %v1633_v46, 16  ;;  %v821_v62 = vrot.slane %v819_v51, 5  ;;  %v1612_v23 = vld [vmem:[%s1813_s5 + $0x70] sm:$0xf] }
  0x57   : > { %v855_v24 = vunpack.c.l.b16 %v780_v8  ;;  %v1181_v57 = vor.u32 %v1180_v44, %v1177_v43  ;;  %v1168_v63 = vrot.slane %v1167_v54, 4  ;;  %v1636_v8 = vld [vmem:[%s1813_s5 + $0x40] sm:$0xf]  ;;  %v1584_v38 = vor.u32 %v1664_v22, %v1583_v21 }
  0x58   : > { %v1172_v0 = vrot.slane %v1170_v55, 5  ;;  %v1186_v2 = vrot.slane %v1184_v58, 5  ;;  %v1203_v17 = vshrl.u32 %v1636_v8, 16  ;;  %v1206_v18 = vshll.u32 %v1636_v8, 16 }
  0x59   : > { %v862_v45 = vpack.c.b16 %v856_v25, %v855_v24  ;;  %v1182_v1 = vrot.slane %v1181_v57, 4  ;;  %v1668_v24 = vld [vmem:[%s1813_s5 + $0x74] sm:$0xf0]  ;;  %v826_v25 = vrot.slane %v824_v9, 4  ;;  %v833_v43 = vshll.u32 %v1556_v31, 16 }
  0x5a   : > { %v1173_v13 = vsel %vm1845_vm4, %v1168_v63, %v1172_v0  ;;  %v1205_v35 = vrot.slane %v1203_v17, 4  ;;  %v1208_v36 = vrot.slane %v1206_v18, 5  ;;  %v1613_v39 = vor.u32 %v1668_v24, %v1612_v23 }
  0x5b   : > { %v1187_v14 = vsel %vm1845_vm4, %v1182_v1, %v1186_v2  ;;  %v1222_v29 = vunpack.c.l.b16 %v1173_v13  ;;  %v830_v42 = vor.u32 %v829_v26, %v826_v25  ;;  %v844_v44 = vor.u32 %v843_v28, %v840_v27  ;;  %v1587_v2 = vld [vmem:[%s1813_s5 + $0x38] sm:$0xf] }
  0x5c   : > { %v1223_v30 = vunpack.c.l.b16 %v1187_v14  ;;  %v1588_v10 = vor.u32 %v1665_v3, %v1587_v2 }
  0x5d   : > { %v845_v54 = vrot.slane %v844_v44, 4 }
  0x5e   : > { %v1228_v46 = vpack.c.b16 %v1223_v30, %v1222_v29 }
  0x64   : > { %1560 = vmatmul.msk.bf16.vlgmr.msra.gmra.mxu1 %vm246_vm1, %v861_v56  ;;  %v1227_v56 = vpack.c.b16 %v1221_v41, %v1220_v40  ;;  %v1635_v40 = vld [vmem:[%s1813_s5 + $0x3c] sm:$0x1]  ;;  %v1637_v41 = vld [vmem:[%s1813_s5 + $0x44] sm:$0x1] }
  0x65   : > { %1589 = vmatmul.msk.bf16.vlgmr.msra.gmra.mxu2 %vm246_vm1, %v1576_v59  ;;  %1618 = vmatmul.msk.bf16.vlgmr.msra.gmra.mxu3 %vm246_vm1, %v1605_v60  ;;  %v803_v59 = vrot.slane %v802_v48, 4  ;;  %v807_v60 = vrot.slane %v805_v49, 5  ;;  %v1195_v48 = vor.u32 %v1194_v34, %v1191_v33  ;;  %v1198_v49 = vshll.u32 %v1635_v40, 16 }
  0x66   : > { %1639 = vmatmul.msk.bf16.vlgmr.msra.gmra.mxu0 %vm246_vm1, %v1226_v61  ;;  %v817_v61 = vrot.slane %v816_v50, 4  ;;  %v1209_v50 = vor.u32 %v1208_v36, %v1205_v35  ;;  %v1212_v51 = vshll.u32 %v1637_v41, 16 }
  0x67   : > { %v808_v5 = vsel %vm1845_vm4, %v803_v59, %v807_v60  ;;  %v1200_v57 = vrot.slane %v1198_v49, 5 }
  0x68   : > { %v822_v6 = vsel %vm1845_vm4, %v817_v61, %v821_v62  ;;  %v857_v19 = vunpack.c.l.b16 %v808_v5  ;;  %v1210_v58 = vrot.slane %v1209_v50, 4  ;;  %v1214_v59 = vrot.slane %v1212_v51, 5  ;;  %v1669_v5 = vld [vmem:[%s1813_s5 + $0x84] sm:$0xf0] }
  0x69   : > { %v858_v20 = vunpack.c.l.b16 %v822_v6  ;;  %v1617_v11 = vor.u32 %v1669_v5, %v1616_v4 }
  0x6a   : > { %v1215_v63 = vsel %vm1845_vm4, %v1210_v58, %v1214_v59 }
  0x6b   : > { %v863_v37 = vpack.c.b16 %v858_v20, %v857_v19  ;;  %v1225_v7 = vunpack.c.l.b16 %v1215_v63 }
  0x74   : > { %1561 = vmatmul.msk.bf16.gmra.mxu1 %vm246_vm1, %v862_v45  ;;  %v847_v45 = vshll.u32 %v1558_v32, 16 }
  0x75   : > { %1590 = vmatmul.msk.bf16.gmra.mxu2 %vm246_vm1, %v1580_v52  ;;  %1619 = vmatmul.msk.bf16.gmra.mxu3 %vm246_vm1, %v1609_v53  ;;  %v831_v52 = vrot.slane %v830_v42, 4  ;;  %v835_v53 = vrot.slane %v833_v43, 5 }
  0x76   : > { %1640 = vmatmul.msk.bf16.gmra.mxu0 %vm246_vm1, %v1227_v56  ;;  %v849_v55 = vrot.slane %v847_v45, 5  ;;  %v1196_v56 = vrot.slane %v1195_v48, 4 }
  0x77   : > { %v836_v60 = vsel %vm1845_vm4, %v831_v52, %v835_v53 }
  0x78   : > { %v850_v61 = vsel %vm1845_vm4, %v845_v54, %v849_v55  ;;  %v1201_v62 = vsel %vm1845_vm4, %v1196_v56, %v1200_v57  ;;  %v859_v0 = vunpack.c.l.b16 %v836_v60 }
  0x79   : > { %v860_v1 = vunpack.c.l.b16 %v850_v61  ;;  %v1224_v6 = vunpack.c.l.b16 %v1201_v62 }
  0x7b   : > { %v864_v8 = vpack.c.b16 %v860_v1, %v859_v0  ;;  %v1229_v12 = vpack.c.b16 %v1225_v7, %v1224_v6 }
  0x84   : > { %1562 = vmatmul.msk.bf16.gmra.mxu1 %vm246_vm1, %v863_v37 }
  0x85   : > { %1591 = vmatmul.msk.bf16.gmra.mxu2 %vm246_vm1, %v1584_v38  ;;  %1620 = vmatmul.msk.bf16.gmra.mxu3 %vm246_vm1, %v1613_v39 }
  0x86   : > { %1641 = vmatmul.msk.bf16.gmra.mxu0 %vm246_vm1, %v1228_v46 }
  0x91   : > { %v277_v9 = vpop.f32.mrf.mxu1 }
  0x93   : > { %v272_v13 = vpop.f32.mrf.mxu0 }
  0x94   : > { %1563 = vmatmul.msk.bf16.gmra.mxu1 %vm246_vm1, %v864_v8 }
  0x95   : > { %1592 = vmatmul.msk.bf16.gmra.mxu2 %vm246_vm1, %v1588_v10  ;;  %1621 = vmatmul.msk.bf16.gmra.mxu3 %vm246_vm1, %v1617_v11 }
  0x96   : > { %1642 = vmatmul.msk.bf16.gmra.mxu0 %vm246_vm1, %v1229_v12 }
  0x98   : > { %v282_v47 = vpop.f32.mrf.mxu2  ;;  %v287_v14 = vpop.f32.mrf.mxu3 }
  0x99   : > { %v2012_v15 = vpop.f32.mrf.mxu1 }
  0x9b   : > { %v274_v16 = vpop.f32.mrf.mxu0 }
  0xa0   : > { %v2014_v17 = vpop.f32.mrf.mxu2  ;;  %v2016_v18 = vpop.f32.mrf.mxu3 }
  0xa1   : > { %v336_v19 = vpop.f32.mrf.mxu1 }
  0xa2   : > { %v337_v20 = vadd.f32 %v336_v19, %v272_v13 }
  0xa3   : > { %v695_v21 = vpop.f32.mrf.mxu0 }
  0xa8   : > { %v525_v22 = vpop.f32.mrf.mxu2  ;;  %v610_v23 = vpop.f32.mrf.mxu3 }
  0xa9   : > { %v545_v24 = vadd.f32 %v525_v22, %v337_v20  ;;  %v338_v25 = vpop.f32.mrf.mxu1 }
  0xaa   : > { %v339_v5 = vadd.f32 %v338_v25, %v274_v16  ;;  %v2044_v16 = vld [vmem:[%s2089_s2] ss:$0 sm:$0xff] }
  0xab   : > { %v630_v26 = vadd.f32 %v610_v23, %v545_v24  ;;  %v697_v27 = vpop.f32.mrf.mxu0 }
  0xad   : > { %v715_v28 = vadd.f32 %v695_v21, %v630_v26 }
  0xb0   : > { %v527_v29 = vpop.f32.mrf.mxu2  ;;  %v612_v30 = vpop.f32.mrf.mxu3 }
  0xb1   : > { %v341_v31 = vpop.f32.mrf.mxu1  ;;  %v546_v7 = vadd.f32 %v527_v29, %v339_v5 }
  0xb2   : > { %v342_v32 = vadd.f32 %v341_v31, %v277_v9 }
  0xb3   : > { %v700_v33 = vpop.f32.mrf.mxu0  ;;  %v631_v11 = vadd.f32 %v612_v30, %v546_v7 }
  0xb5   : > { %v716_v19 = vadd.f32 %v697_v27, %v631_v11 }
  0xb8   : > { %v530_v34 = vpop.f32.mrf.mxu2  ;;  %v615_v35 = vpop.f32.mrf.mxu3 }
  0xb9   : > { %v547_v36 = vadd.f32 %v530_v34, %v342_v32  ;;  %v343_v37 = vpop.f32.mrf.mxu1 }
  0xba   : > { %v344_v26 = vadd.f32 %v343_v37, %v2012_v15 }
  0xbb   : > { %v632_v38 = vadd.f32 %v615_v35, %v547_v36  ;;  %v2018_v39 = vpop.f32.mrf.mxu0 }
  0xbd   : > { %v717_v40 = vadd.f32 %v700_v33, %v632_v38 }
  0xc0   : > { %v532_v41 = vpop.f32.mrf.mxu2  ;;  %v617_v42 = vpop.f32.mrf.mxu3 }
  0xc1   : > { %v346_v43 = vpop.f32.mrf.mxu1  ;;  %v548_v30 = vadd.f32 %v532_v41, %v344_v26 }
  0xc2   : > { %v347_v44 = vadd.f32 %v346_v43, %v282_v47 }
  0xc3   : > { %v705_v45 = vpop.f32.mrf.mxu0  ;;  %v633_v36 = vadd.f32 %v617_v42, %v548_v30 }
  0xc8   : > { %v535_v46 = vpop.f32.mrf.mxu2  ;;  %v620_v48 = vpop.f32.mrf.mxu3 }
  0xc9   : > { %v549_v49 = vadd.f32 %v535_v46, %v347_v44  ;;  %v2020_v50 = vpop.f32.mrf.mxu1  ;;  %v718_v46 = vadd.f32 %v2018_v39, %v633_v36 }
  0xcb   : > { %v634_v51 = vadd.f32 %v620_v48, %v549_v49  ;;  %v2022_v52 = vpop.f32.mrf.mxu0 }
  0xcd   : > { %v2024_v53 = vadd.f32 %v705_v45, %v634_v51 }
  0xd0   : > { %v2026_v54 = vpop.f32.mrf.mxu2  ;;  %v2028_v55 = vpop.f32.mrf.mxu3 }
  0xd1   : > { %v351_v56 = vpop.f32.mrf.mxu1 }
  0xd2   : > { %v352_v57 = vadd.f32 %v351_v56, %v287_v14 }
  0xd3   : > { %v710_v58 = vpop.f32.mrf.mxu0 }
  0xd8   : > { %v540_v59 = vpop.f32.mrf.mxu2  ;;  %v625_v60 = vpop.f32.mrf.mxu3 }
  0xd9   : > { %v551_v61 = vadd.f32 %v540_v59, %v352_v57  ;;  %v2030_v62 = vpop.f32.mrf.mxu1  ;;  %v349_v57 = vadd.f32 %v2020_v50, %v2014_v17 }
  0xdb   : > { %v636_v63 = vadd.f32 %v625_v60, %v551_v61  ;;  %v2032_v0 = vpop.f32.mrf.mxu0  ;;  %v550_v59 = vadd.f32 %v2026_v54, %v349_v57 }
  0xdd   : > { %v2034_v1 = vadd.f32 %v710_v58, %v636_v63  ;;  %v635_v7 = vadd.f32 %v2028_v55, %v550_v59 }
  0xdf   : > { %v720_v54 = vadd.f32 %v2022_v52, %v635_v7 }
  0xe0   : > { %v2036_v2 = vpop.f32.mrf.mxu2  ;;  %v2038_v3 = vpop.f32.mrf.mxu3 }
  0xe1   : > { %v889_v4 = vpop.f32.mrf.mxu1 }
  0xe2   : > { %v909_v8 = vadd.f32 %v889_v4, %v715_v28 }
  0xe3   : > { %v1254_v6 = vpop.f32.mrf.mxu0 }
  0xe8   : > { %v975_v9 = vpop.f32.mrf.mxu2  ;;  %v1060_v10 = vpop.f32.mrf.mxu3 }
  0xe9   : > { %v995_v12 = vadd.f32 %v975_v9, %v909_v8  ;;  %v891_v13 = vpop.f32.mrf.mxu1 }
  0xea   : > { %v910_v20 = vadd.f32 %v891_v13, %v716_v19 }
  0xeb   : > { %v1256_v47 = vpop.f32.mrf.mxu0  ;;  %v1080_v14 = vadd.f32 %v1060_v10, %v995_v12 }
  0xed   : > { %v1274_v23 = vadd.f32 %v1254_v6, %v1080_v14 }
  0xef   : > { %v1286_v27 = vadd.f32 %v2044_v16, %v1274_v23 }
  0xf0   : > { %v977_v21 = vpop.f32.mrf.mxu2  ;;  %v1062_v22 = vpop.f32.mrf.mxu3 }
  0xf1   : > { %v996_v24 = vadd.f32 %v977_v21, %v910_v20  ;;  %v894_v25 = vpop.f32.mrf.mxu1  ;;  %v1294_v38 = vmax.f32 %v1286_v27, 0.0  ;;  %v354_v21 = vadd.f32 %v2030_v62, %v2016_v18 }
  0xf2   : > { %v911_v33 = vadd.f32 %v894_v25, %v717_v40 }
  0xf3   : > { %v1081_v28 = vadd.f32 %v1062_v22, %v996_v24  ;;  %v1259_v29 = vpop.f32.mrf.mxu0  ;;  %v552_v22 = vadd.f32 %v2036_v2, %v354_v21 }
  0xf5   : > { %v1275_v31 = vadd.f32 %v1256_v47, %v1081_v28 }
  0xf7   : > { %v1287_v32 = vadd.f32 %v2044_v16, %v1275_v31 }
  0xf8   : > { %v980_v34 = vpop.f32.mrf.mxu2  ;;  %v1065_v35 = vpop.f32.mrf.mxu3 }
  0xf9   : > { %v1295_v43 = vmax.f32 %v1287_v32, 0.0  ;;  %v997_v44 = vadd.f32 %v980_v34, %v911_v33  ;;  %v896_v45 = vpop.f32.mrf.mxu1 }
  0xfa   : > { %v912_v40 = vadd.f32 %v896_v45, %v718_v46 }
  0xfb   : > { %v1673_v15 = vpack.c.bf16 %v1295_v43, %v1294_v38  ;;  %v1261_v37 = vpop.f32.mrf.mxu0  ;;  %v1082_v41 = vadd.f32 %v1065_v35, %v997_v44 }
  0xfd   : > { %1674 = vst [vmem:[%s2053_s21] sm:$0xff] %v1673_v15   ;;  %v1276_v42 = vadd.f32 %v1259_v29, %v1082_v41  ;;  %v637_v29 = vadd.f32 %v2038_v3, %v552_v22 }
  0xff   : > { %v1288_v60 = vadd.f32 %v2044_v16, %v1276_v42  ;;  %v722_v33 = vadd.f32 %v2032_v0, %v637_v29 }
 0x100   : > { %v982_v48 = vpop.f32.mrf.mxu2  ;;  %v1067_v49 = vpop.f32.mrf.mxu3 }
 0x101   : > { %v998_v51 = vadd.f32 %v982_v48, %v912_v40  ;;  %v899_v56 = vpop.f32.mrf.mxu1  ;;  %v1296_v8 = vmax.f32 %v1288_v60, 0.0 }
 0x102   : > { %v913_v39 = vadd.f32 %v899_v56, %v2024_v53 }
 0x103   : > { %v1083_v58 = vadd.f32 %v1067_v49, %v998_v51  ;;  %v1264_v63 = vpop.f32.mrf.mxu0 }
 0x105   : > { %v1277_v61 = vadd.f32 %v1261_v37, %v1083_v58 }
 0x107   : > { %v1289_v4 = vadd.f32 %v2044_v16, %v1277_v61 }
 0x108   : > { %v985_v5 = vpop.f32.mrf.mxu2  ;;  %v1070_v6 = vpop.f32.mrf.mxu3 }
 0x109   : > { %v1297_v9 = vmax.f32 %v1289_v4, 0.0  ;;  %v999_v10 = vadd.f32 %v985_v5, %v913_v39  ;;  %v901_v17 = vpop.f32.mrf.mxu1 }
 0x10a   : > { %v914_v12 = vadd.f32 %v901_v17, %v720_v54 }
 0x10b   : > { %v1678_v50 = vpack.c.bf16 %v1297_v9, %v1296_v8  ;;  %v1084_v11 = vadd.f32 %v1070_v6, %v999_v10  ;;  %v1266_v13 = vpop.f32.mrf.mxu0 }
 0x10d   : > { %1690 = vst [vmem:[%s2053_s21 + $0x8] sm:$0xff] %v1678_v50   ;;  %v1278_v19 = vadd.f32 %v1264_v63, %v1084_v11 }
 0x10f   : > { %v1290_v23 = vadd.f32 %v2044_v16, %v1278_v19 }
 0x110   : > { %v987_v47 = vpop.f32.mrf.mxu2  ;;  %v1072_v14 = vpop.f32.mrf.mxu3 }
 0x111   : > { %v1000_v20 = vadd.f32 %v987_v47, %v914_v12  ;;  %v904_v53 = vpop.f32.mrf.mxu1  ;;  %v1298_v30 = vmax.f32 %v1290_v23, 0.0 }
 0x112   : > { %v915_v52 = vadd.f32 %v904_v53, %v2034_v1 }
 0x113   : > { %v1085_v55 = vadd.f32 %v1072_v14, %v1000_v20  ;;  %v1269_v32 = vpop.f32.mrf.mxu0 }
 0x115   : > { %v1279_v24 = vadd.f32 %v1266_v13, %v1085_v55 }
 0x117   : > { %v1291_v25 = vadd.f32 %v2044_v16, %v1279_v24 }
 0x118   : > { %v990_v26 = vpop.f32.mrf.mxu2  ;;  %v1075_v28 = vpop.f32.mrf.mxu3 }
 0x119   : > { %v1299_v27 = vmax.f32 %v1291_v25, 0.0  ;;  %v1001_v31 = vadd.f32 %v990_v26, %v915_v52  ;;  %v906_v62 = vpop.f32.mrf.mxu1 }
 0x11a   : > { %v916_v34 = vadd.f32 %v906_v62, %v722_v33 }
 0x11b   : > { %v1683_v18 = vpack.c.bf16 %v1299_v27, %v1298_v30  ;;  %v1086_v2 = vadd.f32 %v1075_v28, %v1001_v31  ;;  %v1271_v44 = vpop.f32.mrf.mxu0 }
 0x11d   : > { %1691 = vst [vmem:[%s2053_s21 + $0x10] sm:$0xff] %v1683_v18   ;;  %v1280_v36 = vadd.f32 %v1269_v32, %v1086_v2 }
 0x11f   : > { %v1292_v3 = vadd.f32 %v2044_v16, %v1280_v36 }
 0x120   : > { %v992_v35 = vpop.f32.mrf.mxu2  ;;  %v1077_v1 = vpop.f32.mrf.mxu3 }
 0x121   : > { %v1002_v38 = vadd.f32 %v992_v35, %v916_v34  ;;  %v1300_v37 = vmax.f32 %v1292_v3, 0.0 }
 0x123   : > { %v1087_v43 = vadd.f32 %v1077_v1, %v1002_v38 }
 0x125   : > { %v1281_v45 = vadd.f32 %v1271_v44, %v1087_v43 }
 0x127   : > { %v1293_v15 = vadd.f32 %v2044_v16, %v1281_v45 }
 0x129   : > { %v1301_v41 = vmax.f32 %v1293_v15, 0.0 }
 0x12b   : > { %v1688_v46 = vpack.c.bf16 %v1301_v41, %v1300_v37 }
 0x12d   : > { %1692 = vst [vmem:[%s2053_s21 + $0x18] sm:$0xff] %v1688_v46  }
 0x12e PF: > { %s13_s14 = sadd.s32 1, %s1744_s14   ;;  %s2093_s12 = smov %s1740_s13 }
 0x12f   : > { %p10_p6 = scmp.ge.s32.totalorder %s13_s14, 4   ;;  %s2094_s13 = smov %s2096_s15 }
 0x131   :  { %12 = sbr.rel (!%p10_p6) target bundleno = 2 (0x2), region = 76 }

// kernel: basic_block_forward.5
= control target key start
LH: loop header
LB: loop body
LE: loop exit
PB: predicated region body
PF: predicated region fallthrough
CT: control target
= control target key end

     0   :  { %s2833_s15 = smov 0   ;;  %s2835_s16 = smov 0   ;;  %s3490_s0 = inlined_call_operand.vmem [shape: bf16[2,10,10,128], index: 0, kind: input, shape index: {}]   ;;  %s3491_s1 = inlined_call_operand.vmem [shape: bf16[9,128,128], index: 1, kind: input, shape index: {}]   ;;  %s3492_s2 = inlined_call_operand.vmem [shape: f32[1,128], index: 2, kind: input, shape index: {}]   ;;  %s3493_s3 = inlined_call_operand.vmem [shape: bf16[2,64,128], index: 3, kind: input, shape index: {}]   ;;  %s3494_s4 = inlined_call_operand.vmem [shape: f32[2,64,128], index: 4, kind: output, shape index: {}]  }
   0x1   :  { %s2837_s17 = smov 0  }
   0x2 LB: > { %s26_s18 = sadd.s32 1, %s2802_s16  ;;  %p2077_p0 = scmp.ge.s32.totalorder %s2806_s17, 1  ;;  %s2806_s17 = sphi %s2837_s17, %s14_s17   ;;  %s2802_s16 = sphi %s2835_s16, %s3500_s16   ;;  %s2798_s15 = sphi %s2833_s15, %s3499_s15  }
   0x3   : > { %p28_p1 = scmp.ge.s32.totalorder %s26_s18, 2  ;;  %p193_p2 = scmp.lt.s32.totalorder %s2806_s17, 3 }
   0x5   : > { %s3502_s18 = smov (%p28_p1, %s26_s18), 0  ;;  %p194_p3 = pnand %p2077_p0, %p193_p2 }
   0x6   : > { %p232_p4 = scmp.lt.s32.totalorder (!%p194_p3), %s2798_s15, 1 }
   0x7   : > { %197 = sbr.rel (%p194_p3) target bundleno = 337 (0x151), region = 36 }
   0xc   : > { %v2658_v0 = vld [vmem:[%s3491_s1 + $0x78] sm:$0xff]  ;;  %v2657_v2 = vld [vmem:[%s3491_s1 + $0x70] sm:$0xff]  ;;  %s3504_s15 = smov (!%p232_p4, %s2798_s15), 1  ;;  %v2656_v6 = vld [vmem:[%s3491_s1 + $0x68] sm:$0xff]  ;;  %vm293_vm0 = vsmask.f32 3328 }
   0xd   : > { %v2666_v1 = vld [vmem:[%s3491_s1 + $0xb8] sm:$0xff]  ;;  %2742 = vmatpush.bf16.msra.mxu1 %v2658_v0  ;;  %489 = vmatpush.bf16.msra.mxu0 %v2658_v0  ;;  %v2665_v3 = vld [vmem:[%s3491_s1 + $0xb0] sm:$0xff]  ;;  %s2758_s29 = smul.u32 80, %s3504_s15  ;;  %v2664_v7 = vld [vmem:[%s3491_s1 + $0xa8] sm:$0xff]  ;;  %vm294_vm1 = vsmask.f32 7440 }
   0xe   : > { %759 = vmatpush.bf16.msra.mxu2 %v2666_v1  ;;  %v2678_v4 = vld [vmem:[%s3491_s1 + $0xf8] sm:$0xff]  ;;  %v2677_v5 = vld [vmem:[%s3491_s1 + $0xf0] sm:$0xff]  ;;  %v2655_v11 = vld [vmem:[%s3491_s1 + $0x60] sm:$0xff]  ;;  %vm643_vm2 = vcmask 1042432   ;;  %vm644_vm3 = vcmask 1046532   ;;  %s2638_s24 = sshll.u32 %s3504_s15, 6 }
   0xf   : > { %897 = vmatpush.bf16.msra.mxu3 %v2678_v4  ;;  %s2881_s12 = scalar_lea.vmem %s3490_s0, %s2758_s29  ;;  %v2663_v16 = vld [vmem:[%s3491_s1 + $0xa0] sm:$0xff]  ;;  %v2676_v17 = vld [vmem:[%s3491_s1 + $0xe8] sm:$0xff]  ;;  %v2654_v29 = vld [vmem:[%s3491_s1 + $0x58] sm:$0xff]  ;;  %s3447_s27 = scalar_lea.vmem %s3494_s4, %s2638_s24 }
  0x10   : > { %v265_v8 = vld [vmem:[%s2881_s12 + $0x20] sm:$0xf]  ;;  %v266_v9 = vld [vmem:[%s2881_s12 + $0x28] sm:$0xf]  ;;  %v2886_v10 = vld [vmem:[%s2881_s12 + $0x24] sm:$0x1] }
  0x11   : > { %2743 = vmatpush.bf16.msra.mxu1 %v2657_v2  ;;  %490 = vmatpush.bf16.msra.mxu0 %v2657_v2  ;;  %v2892_v12 = vld [vmem:[%s2881_s12 + $0x2c] sm:$0x1]  ;;  %v353_v13 = vshrl.u32 %v265_v8, 16  ;;  %v356_v14 = vshll.u32 %v265_v8, 16  ;;  %v367_v15 = vshrl.u32 %v266_v9, 16  ;;  %v370_v18 = vshll.u32 %v266_v9, 16  ;;  %vm2919_vm4 = vmor %vm293_vm0, %vm294_vm1 }
  0x12   : > { %760 = vmatpush.bf16.msra.mxu2 %v2665_v3  ;;  %v261_v19 = vld [vmem:[%s2881_s12] sm:$0xf]  ;;  %v362_v22 = vshll.u32 %v2886_v10, 16  ;;  %v262_v24 = vld [vmem:[%s2881_s12 + $0x8] sm:$0xf]  ;;  %v376_v26 = vshll.u32 %v2892_v12, 16  ;;  %vm2928_vm5 = vmor %vm643_vm2, %vm644_vm3 }
  0x13   : > { %898 = vmatpush.bf16.msra.mxu3 %v2677_v5  ;;  %v355_v20 = vrot.slane %v353_v13, 4  ;;  %v358_v21 = vrot.slane %v356_v14, 5  ;;  %v369_v23 = vrot.slane %v367_v15, 4  ;;  %v372_v25 = vrot.slane %v370_v18, 5  ;;  %v285_v27 = vld [vmem:[%s2881_s12 + $0x4] sm:$0x1] }
  0x14   : > { %v286_v28 = vld [vmem:[%s2881_s12 + $0xc] sm:$0x1]  ;;  %v297_v31 = vshrl.u32 %v261_v19, 16  ;;  %v300_v32 = vshll.u32 %v261_v19, 16  ;;  %v2675_v34 = vld [vmem:[%s3491_s1 + $0xe0] sm:$0xff]  ;;  %v306_v35 = vshll.u32 %v285_v27, 16 }
  0x15   : > { %2744 = vmatpush.bf16.msra.mxu1 %v2656_v6  ;;  %491 = vmatpush.bf16.msra.mxu0 %v2656_v6  ;;  %v359_v30 = vor.u32 %v358_v21, %v355_v20  ;;  %v373_v33 = vor.u32 %v372_v25, %v369_v23  ;;  %v311_v36 = vshrl.u32 %v262_v24, 16  ;;  %v314_v37 = vshll.u32 %v262_v24, 16  ;;  %v619_v38 = vld [vmem:[%s2881_s12] sm:$0xe]  ;;  %v620_v43 = vld [vmem:[%s2881_s12 + $0x8] sm:$0xe] }
  0x16   : > { %761 = vmatpush.bf16.msra.mxu2 %v2664_v7  ;;  %v364_v39 = vrot.slane %v362_v22, 5  ;;  %v299_v40 = vrot.slane %v297_v31, 4  ;;  %v302_v41 = vrot.slane %v300_v32, 5  ;;  %v320_v42 = vshll.u32 %v286_v28, 16  ;;  %v2662_v44 = vld [vmem:[%s3491_s1 + $0x98] sm:$0xff]  ;;  %v2653_v60 = vld [vmem:[%s3491_s1 + $0x50] sm:$0xff] }
  0x17   : > { %899 = vmatpush.bf16.msra.mxu3 %v2676_v17  ;;  %v360_v45 = vrot.slane %v359_v30, 4  ;;  %v378_v46 = vrot.slane %v376_v26, 5  ;;  %v313_v47 = vrot.slane %v311_v36, 4  ;;  %v316_v48 = vrot.slane %v314_v37, 5  ;;  %v2674_v56 = vld [vmem:[%s3491_s1 + $0xd8] sm:$0xff]  ;;  %v2661_v0 = vld [vmem:[%s3491_s1 + $0x90] sm:$0xff] }
  0x18   : > { %v374_v50 = vrot.slane %v373_v33, 4  ;;  %v303_v51 = vor.u32 %v302_v41, %v299_v40  ;;  %v2179_v52 = vrot.slane %v619_v38, 9  ;;  %v648_v53 = vrot.slane %v285_v27, 5  ;;  %v267_v59 = vld [vmem:[%s2881_s12 + $0x30] sm:$0xf]  ;;  %v2652_v14 = vld [vmem:[%s3491_s1 + $0x48] sm:$0xff] }
  0x19   : > { %2745 = vmatpush.bf16.msra.mxu1 %v2655_v11  ;;  %492 = vmatpush.bf16.msra.mxu0 %v2655_v11  ;;  %v308_v54 = vrot.slane %v306_v35, 5  ;;  %v317_v55 = vor.u32 %v316_v48, %v313_v47  ;;  %v2180_v58 = vrot.slane %v620_v43, 9  ;;  %v322_v62 = vrot.slane %v320_v42, 5  ;;  %v268_v3 = vld [vmem:[%s2881_s12 + $0x38] sm:$0xf]  ;;  %v2673_v11 = vld [vmem:[%s3491_s1 + $0xd0] sm:$0xff] }
  0x1a   : > { %762 = vmatpush.bf16.msra.mxu2 %v2663_v16  ;;  %v304_v61 = vrot.slane %v303_v51, 4  ;;  %v652_v63 = vrot.slane %v286_v28, 5  ;;  %v365_v1 = vsel %vm2919_vm4, %v360_v45, %v364_v39  ;;  %v379_v4 = vsel %vm2919_vm4, %v374_v50, %v378_v46  ;;  %v263_v7 = vld [vmem:[%s2881_s12 + $0x10] sm:$0xf]  ;;  %v2660_v19 = vld [vmem:[%s3491_s1 + $0x88] sm:$0xff]  ;;  %v2651_v24 = vld [vmem:[%s3491_s1 + $0x40] sm:$0xff] }
  0x1b   : > { %900 = vmatpush.bf16.msra.mxu3 %v2675_v34  ;;  %v318_v2 = vrot.slane %v317_v55, 4  ;;  %v649_v5 = vsel %vm2928_vm5, %v2179_v52, %v648_v53  ;;  %v381_v6 = vshrl.u32 %v267_v59, 16  ;;  %v384_v13 = vshll.u32 %v267_v59, 16  ;;  %v264_v22 = vld [vmem:[%s2881_s12 + $0x18] sm:$0xf]  ;;  %v2672_v31 = vld [vmem:[%s3491_s1 + $0xc8] sm:$0xff] }
  0x1c   : > { %v309_v8 = vsel %vm2919_vm4, %v304_v61, %v308_v54  ;;  %v653_v9 = vsel %vm2928_vm5, %v2180_v58, %v652_v63  ;;  %v2957_v15 = vunpack.c.l.b16 %v365_v1  ;;  %v395_v17 = vshrl.u32 %v268_v3, 16  ;;  %v2975_v32 = vld [vmem:[%s2881_s12 + $0x34] sm:$0x1]  ;;  %v2978_v36 = vld [vmem:[%s2881_s12 + $0x3c] sm:$0x1]  ;;  %v2659_v42 = vld [vmem:[%s3491_s1 + $0x80] sm:$0xff] }
  0x1d   : > { %2746 = vmatpush.bf16.msra.mxu1 %v2654_v29  ;;  %493 = vmatpush.bf16.msra.mxu0 %v2654_v29  ;;  %v323_v16 = vsel %vm2919_vm4, %v318_v2, %v322_v62  ;;  %v430_v18 = vunpack.c.l.b16 %v379_v4  ;;  %v695_v20 = vunpack.c.l.b16 %v649_v5  ;;  %v398_v21 = vshll.u32 %v268_v3, 16  ;;  %v2650_v29 = vld [vmem:[%s3491_s1 + $0x38] sm:$0xff]  ;;  %v2985_v43 = vld [vmem:[%s2881_s12 + $0x14] sm:$0x1]  ;;  %v2671_v58 = vld [vmem:[%s3491_s1 + $0xc0] sm:$0xff] }
  0x1e   : > { %763 = vmatpush.bf16.msra.mxu2 %v2662_v44  ;;  %v325_v23 = vshrl.u32 %v263_v7, 16  ;;  %v425_v25 = vunpack.c.l.b16 %v309_v8  ;;  %v696_v26 = vunpack.c.l.b16 %v653_v9  ;;  %v383_v27 = vrot.slane %v381_v6, 4  ;;  %v2988_v44 = vld [vmem:[%s2881_s12 + $0x1c] sm:$0x1]  ;;  %v2649_v52 = vld [vmem:[%s3491_s1 + $0x30] sm:$0xff] }
  0x1f   : > { %901 = vmatpush.bf16.msra.mxu3 %v2674_v56  ;;  %v328_v28 = vshll.u32 %v263_v7, 16  ;;  %v426_v30 = vunpack.c.l.b16 %v323_v16  ;;  %v386_v33 = vrot.slane %v384_v13, 5  ;;  %v397_v34 = vrot.slane %v395_v17, 4  ;;  %v2686_v45 = vld [vmem:[%s3491_s1 + $0x138] sm:$0xff]  ;;  %v2261_v63 = vld [vmem:[%s2881_s12 + $0x8] sm:$0xf] }
  0x20   : > { %v400_v35 = vrot.slane %v398_v21, 5  ;;  %v327_v37 = vrot.slane %v325_v23, 4  ;;  %v339_v39 = vshrl.u32 %v264_v22, 16  ;;  %v342_v40 = vshll.u32 %v264_v22, 16  ;;  %v2706_v48 = vld [vmem:[%s3491_s1 + $0x1b8] sm:$0xff]  ;;  %v2685_v1 = vld [vmem:[%s3491_s1 + $0x130] sm:$0xff] }
  0x21   : > { %2747 = vmatpush.bf16.msra.mxu1 %v2653_v60  ;;  %494 = vmatpush.bf16.msra.mxu0 %v2653_v60  ;;  %v330_v38 = vrot.slane %v328_v28, 5  ;;  %v435_v41 = vpack.c.b16 %v430_v18, %v2957_v15  ;;  %v703_v46 = vpack.c.b16 %v696_v26, %v695_v20  ;;  %v390_v47 = vshll.u32 %v2975_v32, 16  ;;  %v2714_v2 = vld [vmem:[%s3491_s1 + $0x1f8] sm:$0xff]  ;;  %v621_v4 = vld [vmem:[%s2881_s12 + $0x10] sm:$0xe]  ;;  %v2704_v26 = vld [vmem:[%s3491_s1 + $0x1a8] sm:$0xff] }
  0x22   : > { %764 = vmatpush.bf16.msra.mxu2 %v2661_v0  ;;  %v341_v50 = vrot.slane %v339_v39, 4  ;;  %v344_v51 = vrot.slane %v342_v40, 5  ;;  %v433_v53 = vpack.c.b16 %v426_v30, %v425_v25  ;;  %v387_v54 = vor.u32 %v386_v33, %v383_v27  ;;  %v2667_v0 = vld [vmem:[%s2881_s12 + $0xc] sm:$0xf0]  ;;  %v622_v5 = vld [vmem:[%s2881_s12 + $0x18] sm:$0xe] }
  0x23   : > { %902 = vmatpush.bf16.msra.mxu3 %v2673_v11  ;;  %v401_v55 = vor.u32 %v400_v35, %v397_v34  ;;  %v404_v56 = vshll.u32 %v2978_v36, 16  ;;  %v331_v59 = vor.u32 %v330_v38, %v327_v37  ;;  %v334_v60 = vshll.u32 %v2985_v43, 16  ;;  %v2705_v6 = vld [vmem:[%s3491_s1 + $0x1b0] sm:$0xff]  ;;  %v2307_v13 = vld [vmem:[%s2881_s12 + $0x8] sm:$0xf]  ;;  %v2647_v37 = vld [vmem:[%s3491_s1 + $0x20] sm:$0xff] }
  0x24   : > { %v345_v61 = vor.u32 %v344_v51, %v341_v50  ;;  %v348_v62 = vshll.u32 %v2988_v44, 16  ;;  %v392_v3 = vrot.slane %v390_v47, 5  ;;  %v388_v7 = vrot.slane %v387_v54, 4  ;;  %v2309_v18 = vld [vmem:[%s2881_s12 + $0x10] sm:$0xf]  ;;  %v2684_v25 = vld [vmem:[%s3491_s1 + $0x128] sm:$0xff] }
  0x25   : > { %2748 = vmatpush.bf16.msra.mxu1 %v2652_v14  ;;  %495 = vmatpush.bf16.msra.mxu0 %v2652_v14  ;;  %v402_v8 = vrot.slane %v401_v55, 4  ;;  %v406_v9 = vrot.slane %v404_v56, 5  ;;  %v2262_v11 = vor.u32 %v2667_v0, %v2261_v63  ;;  %v332_v14 = vrot.slane %v331_v59, 4  ;;  %v2712_v40 = vld [vmem:[%s3491_s1 + $0x1e8] sm:$0xff]  ;;  %v2646_v55 = vld [vmem:[%s3491_s1 + $0x18] sm:$0xff] }
  0x26   : > { %765 = vmatpush.bf16.msra.mxu2 %v2660_v19  ;;  %v336_v15 = vrot.slane %v334_v60, 5  ;;  %v346_v16 = vrot.slane %v345_v61, 4  ;;  %v350_v17 = vrot.slane %v348_v62, 5  ;;  %v2648_v19 = vld [vmem:[%s3491_s1 + $0x28] sm:$0xff]  ;;  %v2181_v20 = vrot.slane %v621_v4, 9 }
  0x27   : > { %903 = vmatpush.bf16.msra.mxu3 %v2672_v31  ;;  %v656_v21 = vrot.slane %v2985_v43, 5  ;;  %v2182_v22 = vrot.slane %v622_v5, 9  ;;  %v660_v23 = vrot.slane %v2988_v44, 5  ;;  %v393_v27 = vsel %vm2919_vm4, %v388_v7, %v392_v3  ;;  %v2683_v43 = vld [vmem:[%s3491_s1 + $0x120] sm:$0xff]  ;;  %v3060_v47 = vld [vmem:[%s2881_s12 + $0xc] sm:$0x1] }
  0x28   : > { %v407_v28 = vsel %vm2919_vm4, %v402_v8, %v406_v9  ;;  %v954_v30 = vshll.u32 %v2307_v13, 16  ;;  %v337_v31 = vsel %vm2919_vm4, %v332_v14, %v336_v15  ;;  %v351_v33 = vsel %vm2919_vm4, %v346_v16, %v350_v17  ;;  %v2703_v44 = vld [vmem:[%s3491_s1 + $0x1a0] sm:$0xff]  ;;  %v3066_v56 = vld [vmem:[%s2881_s12 + $0x14] sm:$0x1]  ;;  %v2265_v62 = vld [vmem:[%s2881_s12 + $0x18] sm:$0xf] }
  0x29   : > { %2749 = vmatpush.bf16.msra.mxu1 %v2651_v24  ;;  %496 = vmatpush.bf16.msra.mxu0 %v2651_v24  ;;  %v2713_v24 = vld [vmem:[%s3491_s1 + $0x1f0] sm:$0xff]  ;;  %v965_v34 = vshrl.u32 %v2309_v18, 16  ;;  %v968_v35 = vshll.u32 %v2309_v18, 16  ;;  %v657_v38 = vsel %vm2928_vm5, %v2181_v20, %v656_v21  ;;  %v661_v39 = vsel %vm2928_vm5, %v2182_v22, %v660_v23  ;;  %v2668_v63 = vld [vmem:[%s2881_s12 + $0x1c] sm:$0xf0]  ;;  %v2702_v17 = vld [vmem:[%s3491_s1 + $0x198] sm:$0xff] }
  0x2a   : > { %766 = vmatpush.bf16.msra.mxu2 %v2659_v42  ;;  %v432_v42 = vunpack.c.l.b16 %v407_v28  ;;  %v956_v50 = vrot.slane %v954_v30, 5  ;;  %v697_v51 = vunpack.c.l.b16 %v657_v38  ;;  %v960_v59 = vshll.u32 %v3060_v47, 16  ;;  %v624_v5 = vld [vmem:[%s2881_s12 + $0x28] sm:$0xe]  ;;  %v2681_v7 = vld [vmem:[%s3491_s1 + $0x110] sm:$0xff]  ;;  %v2711_v21 = vld [vmem:[%s3491_s1 + $0x1e0] sm:$0xff] }
  0x2b   : > { %904 = vmatpush.bf16.msra.mxu3 %v2671_v58  ;;  %v970_v54 = vrot.slane %v968_v35, 5  ;;  %v2682_v58 = vld [vmem:[%s3491_s1 + $0x118] sm:$0xff]  ;;  %v974_v4 = vshll.u32 %v3066_v56, 16  ;;  %v2266_v8 = vor.u32 %v2668_v63, %v2265_v62  ;;  %v664_v14 = vrot.slane %v2886_v10, 5  ;;  %v2644_v10 = vld [vmem:[%s3491_s1 + $0x8] sm:$0xff]  ;;  %v2701_v23 = vld [vmem:[%s3491_s1 + $0x190] sm:$0xff] }
  0x2c   : > { %507 = vmatmul.bf16.vlgmr.msra.gmra.mxu1 %v435_v41  ;;  %497 = vmatmul.bf16.vlgmr.msra.gmra.mxu0 %v433_v53  ;;  %v431_v41 = vunpack.c.l.b16 %v393_v27  ;;  %v967_v53 = vrot.slane %v965_v34, 4  ;;  %v962_v9 = vrot.slane %v960_v59, 5  ;;  %v2184_v15 = vrot.slane %v624_v5, 9  ;;  %v2311_v20 = vld [vmem:[%s2881_s12 + $0x18] sm:$0xf]  ;;  %v2643_v34 = vld [vmem:[%s3491_s1] sm:$0xff] }
  0x2d   : > { %590 = vmatpush.bf16.msrb.mxu1 %v2650_v29  ;;  %1143 = vmatpush.bf16.msrb.mxu0 %v2686_v45  ;;  %v951_v29 = vshrl.u32 %v2307_v13, 16  ;;  %v427_v45 = vunpack.c.l.b16 %v337_v31  ;;  %v668_v16 = vrot.slane %v2892_v12, 5  ;;  %v2313_v22 = vld [vmem:[%s2881_s12 + $0x20] sm:$0xf]  ;;  %v2680_v12 = vld [vmem:[%s3491_s1 + $0x108] sm:$0xff]  ;;  %v979_v28 = vshrl.u32 %v2311_v20, 16 }
  0x2e   : > { %1455 = vmatpush.bf16.msrb.mxu2 %v2706_v48  ;;  %905 = vmatmul.bf16.vlgmr.msra.gmra.mxu3 %v2262_v11  ;;  %v436_v60 = vpack.c.b16 %v432_v42, %v431_v41  ;;  %v971_v3 = vor.u32 %v970_v54, %v967_v53  ;;  %v982_v30 = vshll.u32 %v2311_v20, 16  ;;  %v993_v31 = vshrl.u32 %v2313_v22, 16  ;;  %v2133_v35 = vld [vmem:[%s2881_s12] sm:$0xf]  ;;  %v2693_v53 = vld [vmem:[%s3491_s1 + $0x170] sm:$0xff] }
  0x2f   : > { %767 = vmatmul.bf16.vlgmr.msra.gmra.mxu2 %v703_v46  ;;  %1701 = vmatpush.bf16.msrb.mxu3 %v2714_v2  ;;  %v428_v46 = vunpack.c.l.b16 %v351_v33  ;;  %v953_v48 = vrot.slane %v951_v29, 4  ;;  %v669_v27 = vsel %vm2928_vm5, %v2184_v15, %v668_v16  ;;  %v996_v33 = vshll.u32 %v2313_v22, 16  ;;  %v2679_v38 = vld [vmem:[%s3491_s1 + $0x100] sm:$0xff]  ;;  %v2669_v62 = vld [vmem:[%s2881_s12 + $0x2c] sm:$0xf0] }
  0x30   : > { %v972_v18 = vrot.slane %v971_v3, 4  ;;  %v2315_v3 = vld [vmem:[%s2881_s12 + $0x28] sm:$0xf]  ;;  %v626_v5 = vld [vmem:[%s2881_s12 + $0x38] sm:$0xe]  ;;  %v672_v20 = vrot.slane %v2975_v32, 5 }
  0x31   : > { %591 = vmatpush.bf16.msrb.mxu1 %v2649_v52  ;;  %1144 = vmatpush.bf16.msrb.mxu0 %v2685_v1  ;;  %v698_v52 = vunpack.c.l.b16 %v661_v39  ;;  %v434_v61 = vpack.c.b16 %v428_v46, %v427_v45  ;;  %v957_v0 = vor.u32 %v956_v50, %v953_v48  ;;  %v623_v1 = vld [vmem:[%s2881_s12 + $0x20] sm:$0xe]  ;;  %v2639_v39 = vld [vmem:[%s2881_s12 + $0x4] sm:$0xf0]  ;;  %v3130_v45 = vld [vmem:[%s3491_s1 + $0x238] sm:$0xff]  ;;  %v981_v48 = vrot.slane %v979_v28, 4 }
  0x32   : > { %1456 = vmatpush.bf16.msrb.mxu2 %v2705_v6  ;;  %v2645_v6 = vld [vmem:[%s3491_s1 + $0x10] sm:$0xff]  ;;  %v2183_v11 = vrot.slane %v623_v1, 9  ;;  %v3133_v46 = vld [vmem:[%s2881_s12 + $0x24] sm:$0x1]  ;;  %v984_v50 = vrot.slane %v982_v30, 5  ;;  %v2134_v54 = vor.u32 %v2639_v39, %v2133_v35  ;;  %v1007_v15 = vshrl.u32 %v2315_v3, 16 }
  0x33   : > { %1702 = vmatpush.bf16.msrb.mxu3 %v2713_v24  ;;  %v704_v2 = vpack.c.b16 %v698_v52, %v697_v51  ;;  %v958_v13 = vrot.slane %v957_v0, 4  ;;  %v2710_v24 = vld [vmem:[%s3491_s1 + $0x1d8] sm:$0xff]  ;;  %v995_v51 = vrot.slane %v993_v31, 4  ;;  %v998_v52 = vrot.slane %v996_v33, 5  ;;  %v3146_v1 = vld [vmem:[%s3491_s1 + $0x230] sm:$0xff]  ;;  %v2699_v22 = vld [vmem:[%s3491_s1 + $0x180] sm:$0xff] }
  0x34   : > { %v1002_v59 = vshll.u32 %v3133_v46, 16  ;;  %v985_v63 = vor.u32 %v984_v50, %v981_v48  ;;  %v1010_v16 = vshll.u32 %v2315_v3, 16  ;;  %v2708_v32 = vld [vmem:[%s3491_s1 + $0x1c8] sm:$0xff]  ;;  %v3186_v28 = vld [vmem:[%s3491_s1 + $0x220] sm:$0xff]  ;;  %v2690_v31 = vld [vmem:[%s3491_s1 + $0x158] sm:$0xff] }
  0x35   : > { %592 = vmatpush.bf16.msrb.mxu1 %v2648_v19  ;;  %1145 = vmatpush.bf16.msrb.mxu0 %v2684_v25  ;;  %v976_v19 = vrot.slane %v974_v4, 5  ;;  %v963_v25 = vsel %vm2919_vm4, %v958_v13, %v962_v9  ;;  %v999_v0 = vor.u32 %v998_v52, %v995_v51  ;;  %v625_v4 = vld [vmem:[%s2881_s12 + $0x30] sm:$0xe]  ;;  %v3196_v33 = vld [vmem:[%s2881_s12 + $0x2c] sm:$0x1] }
  0x36   : > { %1457 = vmatpush.bf16.msrb.mxu2 %v2704_v26  ;;  %v665_v26 = vsel %vm2928_vm5, %v2183_v11, %v664_v14  ;;  %v1004_v9 = vrot.slane %v1002_v59, 5  ;;  %v2317_v11 = vld [vmem:[%s2881_s12 + $0x30] sm:$0xf]  ;;  %v986_v13 = vrot.slane %v985_v63, 4  ;;  %v3199_v39 = vld [vmem:[%s2881_s12 + $0x34] sm:$0x1] }
  0x37   : > { %1703 = vmatpush.bf16.msrb.mxu3 %v2712_v40  ;;  %v977_v29 = vsel %vm2919_vm4, %v972_v18, %v976_v19  ;;  %v1079_v40 = vunpack.c.l.b16 %v963_v25  ;;  %v699_v42 = vunpack.c.l.b16 %v665_v26  ;;  %v1000_v14 = vrot.slane %v999_v0, 4  ;;  %v3165_v18 = vld [vmem:[%s3491_s1 + $0x228] sm:$0xff]  ;;  %v2509_v51 = vld [vmem:[%s2881_s12 + $0x18] sm:$0xf]  ;;  %v2670_v63 = vld [vmem:[%s2881_s12 + $0x3c] sm:$0xf0] }
  0x38   : > { %v1080_v41 = vunpack.c.l.b16 %v977_v29  ;;  %v2185_v19 = vrot.slane %v625_v4, 9  ;;  %v1009_v26 = vrot.slane %v1007_v15, 4  ;;  %v1016_v52 = vshll.u32 %v3196_v33, 16  ;;  %v2319_v0 = vld [vmem:[%s2881_s12 + $0x38] sm:$0xf] }
  0x39   : > { %593 = vmatpush.bf16.msrb.mxu1 %v2647_v37  ;;  %1146 = vmatpush.bf16.msrb.mxu0 %v2683_v43  ;;  %v2694_v37 = vld [vmem:[%s3491_s1 + $0x178] sm:$0xff]  ;;  %v700_v43 = vunpack.c.l.b16 %v669_v27  ;;  %v1005_v25 = vsel %vm2919_vm4, %v1000_v14, %v1004_v9  ;;  %v1012_v27 = vrot.slane %v1010_v16, 5  ;;  %v1030_v59 = vshll.u32 %v3199_v39, 16  ;;  %v2321_v16 = vld [vmem:[%s2881_s12 + $0x40] sm:$0xf] }
  0x3a   : > { %1458 = vmatpush.bf16.msrb.mxu2 %v2703_v44  ;;  %v3125_v44 = vld [vmem:[%s2881_s12 + $0x1c] sm:$0x1]  ;;  %v673_v29 = vsel %vm2928_vm5, %v2185_v19, %v672_v20  ;;  %v2707_v19 = vld [vmem:[%s3491_s1 + $0x1c0] sm:$0xff]  ;;  %v1038_v20 = vshll.u32 %v2319_v0, 16 }
  0x3b   : > { %1704 = vmatpush.bf16.msrb.mxu3 %v2711_v21  ;;  %v2186_v21 = vrot.slane %v626_v5, 9  ;;  %v1013_v50 = vor.u32 %v1012_v27, %v1009_v26  ;;  %v3217_v5 = vld [vmem:[%s2881_s12 + $0x14] sm:$0x1]  ;;  %v1032_v15 = vrot.slane %v1030_v59, 5 }
  0x3c   : > { %512 = vmatmul.bf16.gmra.mxu1 %v436_v60  ;;  %502 = vmatmul.bf16.gmra.mxu0 %v434_v61  ;;  %v705_v60 = vpack.c.b16 %v700_v43, %v699_v42  ;;  %v2269_v61 = vld [vmem:[%s2881_s12 + $0x28] sm:$0xf]  ;;  %v2640_v42 = vld [vmem:[%s2881_s12 + $0x14] sm:$0xf0]  ;;  %v701_v43 = vunpack.c.l.b16 %v673_v29  ;;  %v3239_v27 = vld [vmem:[%s3491_s1 + $0x210] sm:$0xff] }
  0x3d   : > { %594 = vmatpush.bf16.msrb.mxu1 %v2646_v55  ;;  %1147 = vmatpush.bf16.msrb.mxu0 %v2682_v58  ;;  %v1087_v55 = vpack.c.b16 %v1080_v41, %v1079_v40  ;;  %v988_v58 = vshll.u32 %v3125_v44, 16  ;;  %v2507_v40 = vld [vmem:[%s2881_s12 + $0x10] sm:$0xf]  ;;  %v1014_v4 = vrot.slane %v1013_v50, 4  ;;  %v2371_v29 = vld [vmem:[%s2881_s12 + $0x8] sm:$0xe] }
  0x3e   : > { %1459 = vmatpush.bf16.msrb.mxu2 %v2702_v17  ;;  %910 = vmatmul.bf16.gmra.mxu3 %v2266_v8  ;;  %v2709_v17 = vld [vmem:[%s3491_s1 + $0x1d0] sm:$0xff] }
  0x3f   : > { %772 = vmatmul.bf16.gmra.mxu2 %v704_v2  ;;  %1705 = vmatpush.bf16.msrb.mxu3 %v2710_v24  ;;  %v2692_v2 = vld [vmem:[%s3491_s1 + $0x168] sm:$0xff]  ;;  %v990_v8 = vrot.slane %v988_v58, 5  ;;  %v1024_v24 = vshll.u32 %v2317_v11, 16  ;;  %v2137_v41 = vld [vmem:[%s2881_s12 + $0x10] sm:$0xf] }
  0x41   : > { %595 = vmatpush.bf16.msrb.mxu1 %v2645_v6  ;;  %1148 = vmatpush.bf16.msrb.mxu0 %v2681_v7  ;;  %v2700_v6 = vld [vmem:[%s3491_s1 + $0x188] sm:$0xff]  ;;  %v2270_v7 = vor.u32 %v2669_v62, %v2269_v61  ;;  %v1026_v35 = vrot.slane %v1024_v24, 5  ;;  %v2138_v61 = vor.u32 %v2640_v42, %v2137_v41  ;;  %v3252_v42 = vld [vmem:[%s2881_s12 + $0x3c] sm:$0x1] }
  0x42   : > { %1460 = vmatpush.bf16.msrb.mxu2 %v2701_v23  ;;  %v1021_v23 = vshrl.u32 %v2317_v11, 16 }
  0x43   : > { %1706 = vmatpush.bf16.msrb.mxu3 %v2709_v17  ;;  %v1035_v17 = vshrl.u32 %v2319_v0, 16 }
  0x45   : > { %596 = vmatpush.bf16.msrb.mxu1 %v2644_v10  ;;  %1149 = vmatpush.bf16.msrb.mxu0 %v2680_v12  ;;  %v676_v10 = vrot.slane %v2978_v36, 5  ;;  %v2691_v12 = vld [vmem:[%s3491_s1 + $0x160] sm:$0xff]  ;;  %v991_v36 = vsel %vm2919_vm4, %v986_v13, %v990_v8 }
  0x46   : > { %1461 = vmatpush.bf16.msrb.mxu2 %v2700_v6  ;;  %v1018_v6 = vrot.slane %v1016_v52, 5 }
  0x47   : > { %v677_v30 = vsel %vm2928_vm5, %v2186_v21, %v676_v10  ;;  %1707 = vmatpush.bf16.msrb.mxu3 %v2708_v32  ;;  %v1518_v10 = vshll.u32 %v3217_v5, 16  ;;  %v1210_v32 = vrot.slane %v3066_v56, 5  ;;  %v1037_v56 = vrot.slane %v1035_v17, 4 }
  0x48   : > { %v702_v48 = vunpack.c.l.b16 %v677_v30 }
  0x49   : > { %597 = vmatpush.bf16.msrb.mxu1 %v2643_v34  ;;  %1150 = vmatpush.bf16.msrb.mxu0 %v2679_v38  ;;  %v1023_v34 = vrot.slane %v1021_v23, 4  ;;  %v1082_v38 = vunpack.c.l.b16 %v1005_v25  ;;  %v1206_v23 = vrot.slane %v3060_v47, 5  ;;  %v1052_v25 = vshll.u32 %v2321_v16, 16 }
  0x4a   : > { %1462 = vmatpush.bf16.msrb.mxu2 %v2699_v22  ;;  %v706_v3 = vpack.c.b16 %v702_v48, %v701_v43  ;;  %v1019_v47 = vsel %vm2919_vm4, %v1014_v4, %v1018_v6  ;;  %v2461_v4 = vld [vmem:[%s2881_s12 + $0x10] sm:$0xf] }
  0x4b   : > { %v1027_v58 = vor.u32 %v1026_v35, %v1023_v34  ;;  %1708 = vmatpush.bf16.msrb.mxu3 %v2707_v19  ;;  %v2372_v34 = vld [vmem:[%s2881_s12 + $0x10] sm:$0xe]  ;;  %v2379_v35 = vrot.slane %v2371_v29, 9  ;;  %v1054_v52 = vrot.slane %v1052_v25, 5 }
  0x4c   : > { %598 = vmatmul.bf16.vlgmr.msrb.gmra.mxu1 %v2134_v54  ;;  %1151 = vmatmul.bf16.vlgmr.msrb.gmra.mxu0 %v1087_v55  ;;  %v1512_v54 = vshll.u32 %v2507_v40, 16  ;;  %v1523_v55 = vshrl.u32 %v2509_v51, 16  ;;  %v2380_v41 = vrot.slane %v2372_v34, 9  ;;  %v2715_v34 = vld [vmem:[%s3491_s1 + $0x200] sm:$0xff] }
  0x4d   : > { %1317 = vmatpush.bf16.msra.mxu1 %v2694_v37  ;;  %1875 = vmatpush.bf16.msra.mxu0 %v3130_v45  ;;  %v1081_v37 = vunpack.c.l.b16 %v991_v36  ;;  %v1028_v14 = vrot.slane %v1027_v58, 4  ;;  %v1049_v36 = vshrl.u32 %v2321_v16, 16  ;;  %v1207_v50 = vsel %vm2928_vm5, %v2379_v35, %v1206_v23  ;;  %v3284_v23 = vld [vmem:[%s2881_s12 + $0x2c] sm:$0x1] }
  0x4e   : > { %915 = vmatmul.bf16.gmra.mxu3 %v2270_v7  ;;  %2750 = vmatpush.bf16.msra.mxu2 %v3130_v45  ;;  %v2273_v45 = vld [vmem:[%s2881_s12 + $0x38] sm:$0xf]  ;;  %v3220_v7 = vld [vmem:[%s2881_s12 + $0x1c] sm:$0x1]  ;;  %v1514_v9 = vrot.slane %v1512_v54, 5  ;;  %v1525_v11 = vrot.slane %v1523_v55, 4  ;;  %v1253_v54 = vunpack.c.l.b16 %v1207_v50  ;;  %v1083_v58 = vunpack.c.l.b16 %v1019_v47 }
  0x4f   : > { %777 = vmatmul.bf16.gmra.mxu2 %v705_v60  ;;  %v2689_v60 = vld [vmem:[%s3491_s1 + $0x150] sm:$0xff]  ;;  %v1088_v62 = vpack.c.b16 %v1082_v38, %v1081_v37  ;;  %v2274_v13 = vor.u32 %v2670_v63, %v2273_v45  ;;  %v1532_v24 = vshll.u32 %v3220_v7, 16  ;;  %v1033_v30 = vsel %vm2919_vm4, %v1028_v14, %v1032_v15  ;;  %v2141_v55 = vld [vmem:[%s2881_s12 + $0x20] sm:$0xf]  ;;  %v2641_v45 = vld [vmem:[%s2881_s12 + $0x24] sm:$0xf0] }
  0x50   : > { %v1040_v37 = vrot.slane %v1038_v20, 5  ;;  %v1084_v59 = vunpack.c.l.b16 %v1033_v30  ;;  %v1044_v63 = vshll.u32 %v3252_v42, 16  ;;  %v2142_v17 = vor.u32 %v2641_v45, %v2141_v55  ;;  %v2145_v55 = vld [vmem:[%s2881_s12 + $0x30] sm:$0xf] }
  0x51   : > { %1318 = vmatpush.bf16.msra.mxu1 %v2693_v53  ;;  %1876 = vmatpush.bf16.msra.mxu0 %v3146_v1  ;;  %v1509_v53 = vshrl.u32 %v2507_v40, 16  ;;  %v1520_v40 = vrot.slane %v1518_v10, 5  ;;  %v1534_v48 = vrot.slane %v1532_v24, 5 }
  0x52   : > { %2751 = vmatpush.bf16.msra.mxu2 %v3146_v1  ;;  %v2688_v1 = vld [vmem:[%s3491_s1 + $0x148] sm:$0xff] }
  0x53   : > { %v1511_v8 = vrot.slane %v1509_v53, 4  ;;  %v1211_v53 = vsel %vm2928_vm5, %v2380_v41, %v1210_v32 }
  0x55   : > { %1319 = vmatpush.bf16.msra.mxu1 %v2692_v2  ;;  %1877 = vmatpush.bf16.msra.mxu0 %v3165_v18  ;;  %v1526_v2 = vshll.u32 %v2509_v51, 16  ;;  %v1515_v21 = vor.u32 %v1514_v9, %v1511_v8  ;;  %v1051_v51 = vrot.slane %v1049_v36, 4 }
  0x56   : > { %2752 = vmatpush.bf16.msra.mxu2 %v3165_v18  ;;  %v2716_v18 = vld [vmem:[%s3491_s1 + $0x208] sm:$0xff] }
  0x57   : > { %v1528_v22 = vrot.slane %v1526_v2, 5  ;;  %v1516_v38 = vrot.slane %v1515_v21, 4  ;;  %v2511_v2 = vld [vmem:[%s2881_s12 + $0x20] sm:$0xf] }
  0x58   : > { %v1537_v9 = vshrl.u32 %v2511_v2, 16 }
  0x59   : > { %1320 = vmatpush.bf16.msra.mxu1 %v2691_v12  ;;  %1878 = vmatpush.bf16.msra.mxu0 %v3186_v28  ;;  %v2718_v12 = vld [vmem:[%s3491_s1 + $0x218] sm:$0xff]  ;;  %v1529_v26 = vor.u32 %v1528_v22, %v1525_v11  ;;  %v1521_v0 = vsel %vm2919_vm4, %v1516_v38, %v1520_v40  ;;  %v1540_v11 = vshll.u32 %v2511_v2, 16  ;;  %v3281_v22 = vld [vmem:[%s2881_s12 + $0x24] sm:$0x1]  ;;  %v2374_v38 = vld [vmem:[%s2881_s12 + $0x20] sm:$0xe] }
  0x5a   : > { %2753 = vmatpush.bf16.msra.mxu2 %v3186_v28  ;;  %v1055_v28 = vor.u32 %v1054_v52, %v1051_v51  ;;  %v1539_v19 = vrot.slane %v1537_v9, 4  ;;  %v1637_v21 = vunpack.c.l.b16 %v1521_v0  ;;  %v1214_v52 = vrot.slane %v3125_v44, 5 }
  0x5b   : > { %v1530_v43 = vrot.slane %v1529_v26, 4  ;;  %v1542_v20 = vrot.slane %v1540_v11, 5  ;;  %v1046_v26 = vrot.slane %v1044_v63, 5  ;;  %v2571_v63 = vld [vmem:[%s2881_s12 + $0x10] sm:$0xe] }
  0x5c   : > { %603 = vmatmul.bf16.gmra.mxu1 %v2138_v61  ;;  %1156 = vmatmul.bf16.gmra.mxu0 %v1088_v62  ;;  %v1254_v61 = vunpack.c.l.b16 %v1211_v53  ;;  %v1041_v62 = vor.u32 %v1040_v37, %v1037_v56  ;;  %v1056_v29 = vrot.slane %v1055_v28, 4  ;;  %v1546_v56 = vshll.u32 %v3281_v22, 16  ;;  %v2373_v37 = vld [vmem:[%s2881_s12 + $0x18] sm:$0xe] }
  0x5d   : > { %1321 = vmatpush.bf16.msra.mxu1 %v2690_v31  ;;  %1879 = vmatpush.bf16.msra.mxu0 %v2718_v12  ;;  %v2687_v31 = vld [vmem:[%s3491_s1 + $0x140] sm:$0xff]  ;;  %v1535_v6 = vsel %vm2919_vm4, %v1530_v43, %v1534_v48  ;;  %v1543_v30 = vor.u32 %v1542_v20, %v1539_v19  ;;  %v2381_v50 = vrot.slane %v2373_v37, 9  ;;  %v2382_v53 = vrot.slane %v2374_v38, 9 }
  0x5e   : > { %920 = vmatmul.bf16.gmra.mxu3 %v2274_v13  ;;  %v3276_v8 = vpack.c.b16 %v1254_v61, %v1253_v54  ;;  %v2695_v13 = vld [vmem:[%s2881_s12 + $0x14] sm:$0xf0]  ;;  %2754 = vmatpush.bf16.msra.mxu2 %v2718_v12  ;;  %v1638_v10 = vunpack.c.l.b16 %v1535_v6  ;;  %v1042_v25 = vrot.slane %v1041_v62, 4  ;;  %v1560_v12 = vshll.u32 %v3284_v23, 16 }
  0x5f   : > { %782 = vmatmul.bf16.gmra.mxu2 %v706_v3  ;;  %v2513_v3 = vld [vmem:[%s2881_s12 + $0x28] sm:$0xf]  ;;  %v2462_v36 = vor.u32 %v2695_v13, %v2461_v4  ;;  %v1548_v43 = vrot.slane %v1546_v56, 5  ;;  %v1218_v54 = vrot.slane %v3133_v46, 5  ;;  %v1764_v62 = vrot.slane %v3217_v5, 5 }
  0x60   : > { %v1551_v15 = vshrl.u32 %v2513_v3, 16  ;;  %v1554_v16 = vshll.u32 %v2513_v3, 16  ;;  %v1047_v40 = vsel %vm2919_vm4, %v1042_v25, %v1046_v26  ;;  %v1562_v48 = vrot.slane %v1560_v12, 5  ;;  %v2572_v3 = vld [vmem:[%s2881_s12 + $0x18] sm:$0xe] }
  0x61   : > { %1322 = vmatpush.bf16.msra.mxu1 %v2689_v60  ;;  %1880 = vmatpush.bf16.msra.mxu0 %v3239_v27  ;;  %v3265_v60 = vld [vmem:[%s2881_s12 + $0x44] sm:$0x1]  ;;  %v1085_v45 = vunpack.c.l.b16 %v1047_v40  ;;  %v1219_v61 = vsel %vm2928_vm5, %v2382_v53, %v1218_v54  ;;  %v2515_v4 = vld [vmem:[%s2881_s12 + $0x30] sm:$0xf]  ;;  %v2517_v6 = vld [vmem:[%s2881_s12 + $0x38] sm:$0xf] }
  0x62   : > { %v1058_v14 = vshll.u32 %v3265_v60, 16  ;;  %v1553_v24 = vrot.slane %v1551_v15, 4  ;;  %v1556_v32 = vrot.slane %v1554_v16, 5  ;;  %2755 = vmatpush.bf16.msra.mxu2 %v3239_v27  ;;  %v1544_v27 = vrot.slane %v1543_v30, 4  ;;  %v2465_v16 = vld [vmem:[%s2881_s12 + $0x20] sm:$0xf] }
  0x63   : > { %v1256_v0 = vunpack.c.l.b16 %v1219_v61  ;;  %v1565_v11 = vshrl.u32 %v2515_v4, 16  ;;  %v1568_v13 = vshll.u32 %v2515_v4, 16  ;;  %v1579_v5 = vshrl.u32 %v2517_v6, 16  ;;  %v2375_v53 = vld [vmem:[%s2881_s12 + $0x28] sm:$0xe] }
  0x64   : > { %v1060_v47 = vrot.slane %v1058_v14, 5  ;;  %v1557_v35 = vor.u32 %v1556_v32, %v1553_v24  ;;  %v1549_v46 = vsel %vm2919_vm4, %v1544_v27, %v1548_v43  ;;  %v1768_v15 = vrot.slane %v3220_v7, 5  ;;  %v2376_v54 = vld [vmem:[%s2881_s12 + $0x30] sm:$0xe]  ;;  %v2573_v4 = vld [vmem:[%s2881_s12 + $0x20] sm:$0xe] }
  0x65   : > { %1323 = vmatpush.bf16.msra.mxu1 %v2688_v1  ;;  %1881 = vmatpush.bf16.msra.mxu0 %v2716_v18  ;;  %v1089_v1 = vpack.c.b16 %v1084_v59, %v1083_v58  ;;  %v1215_v59 = vsel %vm2928_vm5, %v2381_v50, %v1214_v52  ;;  %v1639_v19 = vunpack.c.l.b16 %v1549_v46  ;;  %v1567_v24 = vrot.slane %v1565_v11, 4  ;;  %v2469_v50 = vld [vmem:[%s2881_s12 + $0x30] sm:$0xf]  ;;  %v2574_v11 = vld [vmem:[%s2881_s12 + $0x28] sm:$0xe] }
  0x66   : > { %v1061_v41 = vsel %vm2919_vm4, %v1056_v29, %v1060_v47  ;;  %2756 = vmatpush.bf16.msra.mxu2 %v2716_v18  ;;  %v1558_v51 = vrot.slane %v1557_v35, 4  ;;  %v2642_v18 = vld [vmem:[%s2881_s12 + $0x34] sm:$0xf0]  ;;  %v1255_v44 = vunpack.c.l.b16 %v1215_v59  ;;  %v1570_v32 = vrot.slane %v1568_v13, 5  ;;  %v3321_v29 = vld [vmem:[%s2881_s12 + $0x34] sm:$0x1] }
  0x67   : > { %v1086_v58 = vunpack.c.l.b16 %v1061_v41  ;;  %v2146_v28 = vor.u32 %v2642_v18, %v2145_v55  ;;  %v3324_v47 = vld [vmem:[%s2881_s12 + $0x3c] sm:$0x1]  ;;  %v2519_v55 = vld [vmem:[%s2881_s12 + $0x40] sm:$0xf]  ;;  %v2384_v59 = vrot.slane %v2376_v54, 9  ;;  %v1226_v61 = vrot.slane %v3199_v39, 5 }
  0x68   : > { %v1563_v2 = vsel %vm2919_vm4, %v1558_v51, %v1562_v48  ;;  %v3315_v9 = vpack.c.b16 %v1256_v0, %v1255_v44  ;;  %v1571_v12 = vor.u32 %v1570_v32, %v1567_v24  ;;  %v1588_v35 = vshll.u32 %v3324_v47, 16  ;;  %v2521_v18 = vld [vmem:[%s2881_s12 + $0x48] sm:$0xf] }
  0x69   : > { %1324 = vmatpush.bf16.msra.mxu1 %v2687_v31  ;;  %v1645_v31 = vpack.c.b16 %v1638_v10, %v1637_v21  ;;  %1882 = vmatpush.bf16.msra.mxu0 %v2715_v34  ;;  %v1090_v14 = vpack.c.b16 %v1086_v58, %v1085_v45  ;;  %v1640_v20 = vunpack.c.l.b16 %v1563_v2  ;;  %v2579_v21 = vrot.slane %v2571_v63, 9 }
  0x6a   : > { %2757 = vmatpush.bf16.msra.mxu2 %v2715_v34  ;;  %v2580_v10 = vrot.slane %v2572_v3, 9  ;;  %v1572_v40 = vrot.slane %v1571_v12, 4  ;;  %v1590_v43 = vrot.slane %v1588_v35, 5  ;;  %v2383_v45 = vrot.slane %v2375_v53, 9 }
  0x6b   : > { %v1646_v30 = vpack.c.b16 %v1640_v20, %v1639_v19  ;;  %v1765_v7 = vsel %vm2928_vm5, %v2579_v21, %v1764_v62  ;;  %v1222_v58 = vrot.slane %v3196_v33, 5  ;;  %v2697_v62 = vld [vmem:[%s2881_s12 + $0x34] sm:$0xf0]  ;;  %v1593_v63 = vshrl.u32 %v2519_v55, 16 }
  0x6c   : > { %608 = vmatmul.bf16.gmra.mxu1 %v2142_v17  ;;  %1161 = vmatmul.bf16.gmra.mxu0 %v1089_v1  ;;  %v2696_v17 = vld [vmem:[%s2881_s12 + $0x24] sm:$0xf0]  ;;  %v1582_v1 = vshll.u32 %v2517_v6, 16  ;;  %v1769_v56 = vsel %vm2928_vm5, %v2580_v10, %v1768_v15  ;;  %v1811_v37 = vunpack.c.l.b16 %v1765_v7  ;;  %v1596_v44 = vshll.u32 %v2519_v55, 16  ;;  %v3351_v15 = vld [vmem:[%s2881_s12 + $0x44] sm:$0x1] }
  0x6d   : > { %v2466_v26 = vor.u32 %v2696_v17, %v2465_v16  ;;  %v1812_v38 = vunpack.c.l.b16 %v1769_v56  ;;  %v1607_v0 = vshrl.u32 %v2521_v18, 16  ;;  %v1610_v46 = vshll.u32 %v2521_v18, 16  ;;  %v3354_v16 = vld [vmem:[%s2881_s12 + $0x4c] sm:$0x1] }
  0x6e   : > { %1709 = vmatmul.bf16.vlgmr.msrb.gmra.mxu3 %v1645_v31  ;;  %v1584_v25 = vrot.slane %v1582_v1, 5  ;;  %v1574_v31 = vshll.u32 %v3321_v29, 16  ;;  %v1223_v6 = vsel %vm2928_vm5, %v2383_v45, %v1222_v58  ;;  %v1227_v33 = vsel %vm2928_vm5, %v2384_v59, %v1226_v61  ;;  %v2576_v61 = vld [vmem:[%s2881_s12 + $0x38] sm:$0xe] }
  0x6f   : > { %1463 = vmatmul.bf16.vlgmr.msrb.gmra.mxu2 %v2462_v36  ;;  %v1581_v36 = vrot.slane %v1579_v5, 4  ;;  %v1819_v48 = vpack.c.b16 %v1812_v38, %v1811_v37  ;;  %v1257_v13 = vunpack.c.l.b16 %v1223_v6  ;;  %v1258_v39 = vunpack.c.l.b16 %v1227_v33  ;;  %v2377_v38 = vld [vmem:[%s2881_s12 + $0x38] sm:$0xe] }
  0x70   : > { %v1576_v41 = vrot.slane %v1574_v31, 5  ;;  %v1595_v5 = vrot.slane %v1593_v63, 4  ;;  %v1609_v17 = vrot.slane %v1607_v0, 4  ;;  %v1612_v1 = vrot.slane %v1610_v46, 5  ;;  %v2578_v63 = vld [vmem:[%s2881_s12 + $0x48] sm:$0xe] }
  0x71   : > { %v1585_v34 = vor.u32 %v1584_v25, %v1581_v36  ;;  %v2581_v19 = vrot.slane %v2573_v4, 9  ;;  %v3356_v20 = vpack.c.b16 %v1258_v39, %v1257_v13  ;;  %v1772_v10 = vrot.slane %v3281_v22, 5 }
  0x72   : > { %v1577_v51 = vsel %vm2919_vm4, %v1572_v40, %v1576_v41  ;;  %v2582_v24 = vrot.slane %v2574_v11, 9  ;;  %v1776_v32 = vrot.slane %v3284_v23, 5  ;;  %v1602_v25 = vshll.u32 %v3351_v15, 16  ;;  %v2378_v40 = vld [vmem:[%s2881_s12 + $0x40] sm:$0xe] }
  0x73   : > { %v1586_v27 = vrot.slane %v1585_v34, 4  ;;  %v1641_v2 = vunpack.c.l.b16 %v1577_v51  ;;  %v1773_v7 = vsel %vm2928_vm5, %v2581_v19, %v1772_v10  ;;  %v2385_v41 = vrot.slane %v2377_v38, 9  ;;  %v2698_v51 = vld [vmem:[%s2881_s12 + $0x44] sm:$0xf0] }
  0x74   : > { %v1777_v22 = vsel %vm2928_vm5, %v2582_v24, %v1776_v32  ;;  %v1604_v23 = vrot.slane %v1602_v25, 5  ;;  %v1813_v31 = vunpack.c.l.b16 %v1773_v7  ;;  %v1780_v0 = vrot.slane %v3321_v29, 5 }
  0x75   : > { %v1591_v52 = vsel %vm2919_vm4, %v1586_v27, %v1590_v43  ;;  %v1814_v34 = vunpack.c.l.b16 %v1777_v22  ;;  %v1230_v27 = vrot.slane %v3252_v42, 5  ;;  %v2386_v43 = vrot.slane %v2378_v40, 9  ;;  %v2575_v42 = vld [vmem:[%s2881_s12 + $0x30] sm:$0xe] }
  0x76   : > { %v1642_v3 = vunpack.c.l.b16 %v1591_v52  ;;  %v2584_v46 = vrot.slane %v2576_v61, 9  ;;  %v1792_v4 = vrot.slane %v3354_v16, 5  ;;  %v2586_v33 = vrot.slane %v2578_v63, 9 }
  0x77   : > { %v1820_v52 = vpack.c.b16 %v1814_v34, %v1813_v31  ;;  %v1231_v53 = vsel %vm2928_vm5, %v2385_v41, %v1230_v27 }
  0x78   : > { %v1647_v21 = vpack.c.b16 %v1642_v3, %v1641_v2  ;;  %v1259_v45 = vunpack.c.l.b16 %v1231_v53  ;;  %v1784_v2 = vrot.slane %v3324_v47, 5  ;;  %v1788_v3 = vrot.slane %v3351_v15, 5 }
  0x79   : > { %v1793_v29 = vsel %vm2928_vm5, %v2586_v33, %v1792_v4 }
  0x7c   : > { %613 = vmatmul.bf16.gmra.mxu1 %v2146_v28  ;;  %1166 = vmatmul.bf16.gmra.mxu0 %v1090_v14  ;;  %v1598_v28 = vrot.slane %v1596_v44, 5  ;;  %v2470_v14 = vor.u32 %v2697_v62, %v2469_v50  ;;  %v2473_v50 = vld [vmem:[%s2881_s12 + $0x40] sm:$0xf]  ;;  %v2583_v44 = vrot.slane %v2575_v42, 9 }
  0x7d   : > { %v2474_v59 = vor.u32 %v2698_v51, %v2473_v50  ;;  %v2577_v62 = vld [vmem:[%s2881_s12 + $0x40] sm:$0xe]  ;;  %s2637_s12 = sshll.u32 %s3504_s15, 5 }
  0x7e   : > { %1714 = vmatmul.bf16.gmra.mxu3 %v1646_v30  ;;  %v1599_v36 = vor.u32 %v1598_v28, %v1595_v5  ;;  %v1616_v30 = vshll.u32 %v3354_v16, 16  ;;  %v2585_v6 = vrot.slane %v2577_v62, 9  ;;  %v1781_v11 = vsel %vm2928_vm5, %v2583_v44, %v1780_v0  ;;  %s3433_s21 = scalar_lea.vmem %s3493_s3, %s2637_s12 }
  0x7f   : > { %1468 = vmatmul.bf16.gmra.mxu2 %v2466_v26  ;;  %v1613_v26 = vor.u32 %v1612_v1, %v1609_v17  ;;  %v1815_v47 = vunpack.c.l.b16 %v1781_v11  ;;  %v1818_v28 = vunpack.c.l.b16 %v1793_v29 }
  0x80   : > { %v1618_v12 = vrot.slane %v1616_v30, 5  ;;  %v1789_v13 = vsel %vm2928_vm5, %v2585_v6, %v1788_v3 }
  0x81   : > { %v1614_v56 = vrot.slane %v1613_v26, 4  ;;  %v1817_v5 = vunpack.c.l.b16 %v1789_v13 }
  0x83   : > { %v1619_v37 = vsel %vm2919_vm4, %v1614_v56, %v1618_v12  ;;  %v1822_v17 = vpack.c.b16 %v1818_v28, %v1817_v5 }
  0x84   : > { %v1644_v55 = vunpack.c.l.b16 %v1619_v37 }
  0x8c   : > { %1325 = vmatmul.bf16.vlgmr.msra.gmra.mxu1 %v3276_v8  ;;  %1883 = vmatmul.bf16.vlgmr.msra.gmra.mxu0 %v1819_v48  ;;  %v1600_v8 = vrot.slane %v1599_v36, 4  ;;  %v1234_v48 = vrot.slane %v3265_v60, 5 }
  0x8e   : > { %1719 = vmatmul.bf16.gmra.mxu3 %v1647_v21  ;;  %v1605_v35 = vsel %vm2919_vm4, %v1600_v8, %v1604_v23  ;;  %v1235_v49 = vsel %vm2928_vm5, %v2386_v43, %v1234_v48 }
  0x8f   : > { %1473 = vmatmul.bf16.gmra.mxu2 %v2470_v14  ;;  %v1643_v54 = vunpack.c.l.b16 %v1605_v35  ;;  %v1260_v58 = vunpack.c.l.b16 %v1235_v49 }
  0x91   : > { %v1264_v18 = vpack.c.b16 %v1260_v58, %v1259_v45  ;;  %v1648_v60 = vpack.c.b16 %v1644_v55, %v1643_v54 }
  0x9c   : > { %1330 = vmatmul.bf16.gmra.mxu1 %v3315_v9  ;;  %1888 = vmatmul.bf16.gmra.mxu0 %v1820_v52  ;;  %v1785_v9 = vsel %vm2928_vm5, %v2584_v46, %v1784_v2 }
  0x9d   : > { %v1816_v39 = vunpack.c.l.b16 %v1785_v9 }
  0x9e   : > { %1724 = vmatmul.bf16.gmra.mxu3 %v1648_v60 }
  0x9f   : > { %1478 = vmatmul.bf16.gmra.mxu2 %v2474_v59  ;;  %v1821_v14 = vpack.c.b16 %v1816_v39, %v1815_v47 }
  0xa9   : > { %v508_v15 = vpop.f32.mrf.mxu1  ;;  %v498_v16 = vpop.f32.mrf.mxu0 }
  0xac   : > { %1335 = vmatmul.bf16.gmra.mxu1 %v3356_v20  ;;  %1893 = vmatmul.bf16.gmra.mxu0 %v1821_v14 }
  0xaf   : > { %1898 = vmatmul.bf16.vlgmr.msra.gmra.mxu2 %v1822_v17 }
  0xb1   : > { %v510_v19 = vpop.f32.mrf.mxu1  ;;  %v500_v21 = vpop.f32.mrf.mxu0 }
  0xb2   : > { %v768_v1 = vpop.f32.mrf.mxu2  ;;  %v906_v10 = vpop.f32.mrf.mxu3 }
  0xb9   : > { %v513_v32 = vpop.f32.mrf.mxu1  ;;  %v503_v57 = vpop.f32.mrf.mxu0 }
  0xba   : > { %v770_v24 = vpop.f32.mrf.mxu2  ;;  %v908_v36 = vpop.f32.mrf.mxu3 }
  0xbc   : > { %1340 = vmatmul.bf16.gmra.mxu1 %v1264_v18 }
  0xc1   : > { %v515_v26 = vpop.f32.mrf.mxu1  ;;  %v505_v30 = vpop.f32.mrf.mxu0 }
  0xc2   : > { %v773_v25 = vpop.f32.mrf.mxu2  ;;  %v3399_v7 = vpop.f32.mrf.mxu3 }
  0xc9   : > { %v599_v8 = vpop.f32.mrf.mxu1  ;;  %v1152_v23 = vpop.f32.mrf.mxu0 }
  0xca   : > { %v775_v22 = vpop.f32.mrf.mxu2  ;;  %v600_v20 = vadd.f32 %v599_v8, %v498_v16  ;;  %v3401_v12 = vpop.f32.mrf.mxu3 }
  0xcc   : > { %v788_v56 = vadd.f32 %v768_v1, %v600_v20 }
  0xce   : > { %v926_v39 = vadd.f32 %v906_v10, %v788_v56 }
  0xd0   : > { %v1172_v28 = vadd.f32 %v1152_v23, %v926_v39 }
  0xd1   : > { %v601_v34 = vpop.f32.mrf.mxu1  ;;  %v1154_v35 = vpop.f32.mrf.mxu0 }
  0xd2   : > { %v778_v31 = vpop.f32.mrf.mxu2  ;;  %v602_v37 = vadd.f32 %v601_v34, %v500_v21  ;;  %v3403_v40 = vpop.f32.mrf.mxu3 }
  0xd4   : > { %v789_v38 = vadd.f32 %v770_v24, %v602_v37  ;;  %v2724_v24 = vld [vmem:[%s3433_s21] sm:$0xff]  }
  0xd9   : > { %v604_v27 = vpop.f32.mrf.mxu1  ;;  %v1157_v43 = vpop.f32.mrf.mxu0 }
  0xda   : > { %v780_v41 = vpop.f32.mrf.mxu2  ;;  %v605_v48 = vadd.f32 %v604_v27, %v503_v57  ;;  %v3405_v52 = vpop.f32.mrf.mxu3  ;;  %v2726_v27 = vunpack.c.h.bf16 %v2724_v24 }
  0xdc   : > { %v790_v50 = vadd.f32 %v773_v25, %v605_v48 }
  0xe1   : > { %v606_v53 = vpop.f32.mrf.mxu1  ;;  %v3407_v49 = vpop.f32.mrf.mxu0 }
  0xe2   : > { %v783_v51 = vpop.f32.mrf.mxu2  ;;  %v607_v54 = vadd.f32 %v606_v53, %v505_v30  ;;  %v3411_v61 = vpop.f32.mrf.mxu3 }
  0xe4   : > { %v791_v55 = vadd.f32 %v775_v22, %v607_v54 }
  0xe6   : > { %v929_v53 = vadd.f32 %v3401_v12, %v791_v55 }
  0xe9   : > { %v609_v58 = vpop.f32.mrf.mxu1  ;;  %v3409_v59 = vpop.f32.mrf.mxu0 }
  0xea   : > { %v785_v45 = vpop.f32.mrf.mxu2  ;;  %v610_v42 = vadd.f32 %v609_v58, %v508_v15  ;;  %v3419_v46 = vpop.f32.mrf.mxu3 }
  0xec   : > { %v3413_v18 = vadd.f32 %v778_v31, %v610_v42  ;;  %v2739_v42 = vld [vmem:[%s3433_s21 + $0x8] sm:$0xff]  }
  0xee   : > { %v930_v12 = vadd.f32 %v3403_v40, %v3413_v18 }
  0xf1   : > { %v611_v63 = vpop.f32.mrf.mxu1  ;;  %v3415_v60 = vpop.f32.mrf.mxu0 }
  0xf2   : > { %v1464_v62 = vpop.f32.mrf.mxu2  ;;  %v612_v44 = vadd.f32 %v611_v63, %v510_v19  ;;  %v1710_v11 = vpop.f32.mrf.mxu3  ;;  %v927_v19 = vadd.f32 %v908_v36, %v789_v38  ;;  %v928_v36 = vadd.f32 %v3399_v7, %v790_v50 }
  0xf4   : > { %v3417_v0 = vadd.f32 %v780_v41, %v612_v44  ;;  %v1173_v57 = vadd.f32 %v1154_v35, %v927_v19  ;;  %v1174_v38 = vadd.f32 %v1157_v43, %v928_v36  ;;  %v1175_v43 = vadd.f32 %v3407_v49, %v929_v53 }
  0xf6   : > { %v931_v40 = vadd.f32 %v3405_v52, %v3417_v0 }
  0xf9   : > { %v614_v3 = vpop.f32.mrf.mxu1  ;;  %v3421_v4 = vpop.f32.mrf.mxu0 }
  0xfa   : > { %v1466_v2 = vpop.f32.mrf.mxu2  ;;  %v615_v6 = vadd.f32 %v614_v3, %v513_v32  ;;  %v1712_v14 = vpop.f32.mrf.mxu3  ;;  %v3439_v32 = vld [vmem:[%s3492_s2] ss:$0 sm:$0xff]  ;;  %v2729_v3 = vunpack.c.l.bf16 %v2739_v42 }
  0xfc   : > { %v3423_v33 = vadd.f32 %v783_v51, %v615_v6 }
  0xfe   : > { %v932_v52 = vadd.f32 %v3411_v61, %v3423_v33 }
 0x101   : > { %v616_v13 = vpop.f32.mrf.mxu1  ;;  %v3425_v29 = vpop.f32.mrf.mxu0 }
 0x102   : > { %v1469_v9 = vpop.f32.mrf.mxu2  ;;  %v617_v47 = vadd.f32 %v616_v13, %v515_v26  ;;  %v2725_v26 = vunpack.c.l.bf16 %v2724_v24  ;;  %v1715_v20 = vpop.f32.mrf.mxu3 }
 0x104   : > { %v3427_v5 = vadd.f32 %v785_v45, %v617_v47 }
 0x106   : > { %v933_v61 = vadd.f32 %v3419_v46, %v3427_v5 }
 0x109   : > { %v1326_v15 = vpop.f32.mrf.mxu1  ;;  %v1884_v16 = vpop.f32.mrf.mxu0 }
 0x10a   : > { %v1346_v17 = vadd.f32 %v1326_v15, %v1172_v28  ;;  %v1471_v1 = vpop.f32.mrf.mxu2  ;;  %v1717_v58 = vpop.f32.mrf.mxu3  ;;  %v1176_v15 = vadd.f32 %v3409_v59, %v930_v12  ;;  %v1177_v59 = vadd.f32 %v3415_v60, %v931_v40  ;;  %v1178_v60 = vadd.f32 %v3421_v4, %v932_v52 }
 0x10b   : > { %v1179_v4 = vadd.f32 %v3425_v29, %v933_v61 }
 0x10c   : > { %v1484_v21 = vadd.f32 %v1464_v62, %v1346_v17 }
 0x10e   : > { %v1730_v10 = vadd.f32 %v1710_v11, %v1484_v21 }
 0x110   : > { %v1904_v25 = vadd.f32 %v1884_v16, %v1730_v10  ;;  %v2730_v16 = vunpack.c.h.bf16 %v2739_v42 }
 0x111   : > { %v1328_v30 = vpop.f32.mrf.mxu1  ;;  %v1886_v22 = vpop.f32.mrf.mxu0 }
 0x112   : > { %v1916_v8 = vadd.f32 %v3439_v32, %v1904_v25  ;;  %v1347_v23 = vadd.f32 %v1328_v30, %v1173_v57  ;;  %v1474_v34 = vpop.f32.mrf.mxu2  ;;  %v2740_v57 = vld [vmem:[%s3433_s21 + $0x10] sm:$0xff]  }
 0x114   : > { %v1940_v56 = vadd.f32 %v2725_v26, %v1916_v8  ;;  %v1485_v31 = vadd.f32 %v1466_v2, %v1347_v23 }
 0x116   : > { %v1948_v35 = vmax.f32 %v1940_v56, 0.0  ;;  %v1731_v37 = vadd.f32 %v1712_v14, %v1485_v31  ;;  %v1720_v14 = vpop.f32.mrf.mxu3 }
 0x118   : > { %1956 = vst [vmem:[%s3447_s27] sm:$0xff] %v1948_v35  ;;  %v1905_v41 = vadd.f32 %v1886_v22, %v1731_v37  ;;  %v2733_v22 = vunpack.c.l.bf16 %v2740_v57 }
 0x119   : > { %v1331_v48 = vpop.f32.mrf.mxu1  ;;  %v1889_v51 = vpop.f32.mrf.mxu0 }
 0x11a   : > { %v1917_v7 = vadd.f32 %v3439_v32, %v1905_v41  ;;  %v1348_v50 = vadd.f32 %v1331_v48, %v1174_v38  ;;  %v1476_v44 = vpop.f32.mrf.mxu2  ;;  %v2734_v41 = vunpack.c.h.bf16 %v2740_v57 }
 0x11c   : > { %v1941_v54 = vadd.f32 %v2726_v27, %v1917_v7  ;;  %v1486_v45 = vadd.f32 %v1469_v9, %v1348_v50 }
 0x11e   : > { %v1949_v62 = vmax.f32 %v1941_v54, 0.0  ;;  %v1732_v63 = vadd.f32 %v1715_v20, %v1486_v45  ;;  %v1722_v8 = vpop.f32.mrf.mxu3  ;;  %v2741_v54 = vld [vmem:[%s3433_s21 + $0x18] sm:$0xff]  }
 0x120   : > { %1957 = vst [vmem:[%s3447_s27 + $0x8] sm:$0xff] %v1949_v62  ;;  %v1906_v2 = vadd.f32 %v1889_v51, %v1732_v63  ;;  %v2737_v62 = vunpack.c.l.bf16 %v2741_v54 }
 0x121   : > { %v1333_v6 = vpop.f32.mrf.mxu1  ;;  %v1891_v11 = vpop.f32.mrf.mxu0 }
 0x122   : > { %v1918_v13 = vadd.f32 %v3439_v32, %v1906_v2  ;;  %v1349_v47 = vadd.f32 %v1333_v6, %v1175_v43  ;;  %v1479_v17 = vpop.f32.mrf.mxu2 }
 0x124   : > { %v1942_v55 = vadd.f32 %v2729_v3, %v1918_v13  ;;  %v1487_v9 = vadd.f32 %v1471_v1, %v1349_v47  ;;  %v2738_v47 = vunpack.c.h.bf16 %v2741_v54 }
 0x126   : > { %v1950_v39 = vmax.f32 %v1942_v55, 0.0  ;;  %v1733_v28 = vadd.f32 %v1717_v58, %v1487_v9  ;;  %v1725_v7 = vpop.f32.mrf.mxu3 }
 0x128   : > { %1958 = vst [vmem:[%s3447_s27 + $0x10] sm:$0xff] %v1950_v39  ;;  %v1907_v49 = vadd.f32 %v1891_v11, %v1733_v28 }
 0x129   : > { %v1336_v19 = vpop.f32.mrf.mxu1  ;;  %v1894_v10 = vpop.f32.mrf.mxu0 }
 0x12a   : > { %v1919_v21 = vadd.f32 %v3439_v32, %v1907_v49  ;;  %v1350_v24 = vadd.f32 %v1336_v19, %v1176_v15  ;;  %v1481_v56 = vpop.f32.mrf.mxu2 }
 0x12c   : > { %v1943_v18 = vadd.f32 %v2730_v16, %v1919_v21  ;;  %v1488_v1 = vadd.f32 %v1474_v34, %v1350_v24 }
 0x12e   : > { %v1951_v25 = vmax.f32 %v1943_v18, 0.0  ;;  %v1734_v26 = vadd.f32 %v1720_v14, %v1488_v1  ;;  %v1727_v46 = vpop.f32.mrf.mxu3 }
 0x130   : > { %1959 = vst [vmem:[%s3447_s27 + $0x18] sm:$0xff] %v1951_v25  ;;  %v1908_v30 = vadd.f32 %v1894_v10, %v1734_v26 }
 0x131   : > { %v1338_v23 = vpop.f32.mrf.mxu1  ;;  %v1896_v34 = vpop.f32.mrf.mxu0 }
 0x132   : > { %v1920_v20 = vadd.f32 %v3439_v32, %v1908_v30  ;;  %v1351_v36 = vadd.f32 %v1338_v23, %v1177_v59  ;;  %v1899_v53 = vpop.f32.mrf.mxu2 }
 0x134   : > { %v1944_v0 = vadd.f32 %v2733_v22, %v1920_v20  ;;  %v1489_v31 = vadd.f32 %v1476_v44, %v1351_v36 }
 0x136   : > { %v1952_v35 = vmax.f32 %v1944_v0, 0.0  ;;  %v1735_v37 = vadd.f32 %v1722_v8, %v1489_v31 }
 0x138   : > { %1960 = vst [vmem:[%s3447_s27 + $0x20] sm:$0xff] %v1952_v35  ;;  %v1909_v38 = vadd.f32 %v1896_v34, %v1735_v37 }
 0x139   : > { %v1341_v27 = vpop.f32.mrf.mxu1 }
 0x13a   : > { %v1921_v48 = vadd.f32 %v3439_v32, %v1909_v38  ;;  %v1352_v51 = vadd.f32 %v1341_v27, %v1178_v60  ;;  %v1901_v11 = vpop.f32.mrf.mxu2 }
 0x13c   : > { %v1945_v33 = vadd.f32 %v2734_v41, %v1921_v48  ;;  %v1490_v50 = vadd.f32 %v1479_v17, %v1352_v51 }
 0x13e   : > { %v1953_v45 = vmax.f32 %v1945_v33, 0.0  ;;  %v1736_v58 = vadd.f32 %v1725_v7, %v1490_v50 }
 0x140   : > { %1961 = vst [vmem:[%s3447_s27 + $0x28] sm:$0xff] %v1953_v45  ;;  %v1910_v42 = vadd.f32 %v1899_v53, %v1736_v58 }
 0x141   : > { %v1343_v63 = vpop.f32.mrf.mxu1 }
 0x142   : > { %v1922_v44 = vadd.f32 %v3439_v32, %v1910_v42  ;;  %v1353_v43 = vadd.f32 %v1343_v63, %v1179_v4 }
 0x144   : > { %v1946_v2 = vadd.f32 %v2737_v62, %v1922_v44  ;;  %v1491_v3 = vadd.f32 %v1481_v56, %v1353_v43 }
 0x146   : > { %v1954_v5 = vmax.f32 %v1946_v2, 0.0  ;;  %v1737_v6 = vadd.f32 %v1727_v46, %v1491_v3 }
 0x148   : > { %1962 = vst [vmem:[%s3447_s27 + $0x30] sm:$0xff] %v1954_v5  ;;  %v1911_v13 = vadd.f32 %v1901_v11, %v1737_v6 }
 0x14a   : > { %v1923_v12 = vadd.f32 %v3439_v32, %v1911_v13 }
 0x14c   : > { %v1947_v29 = vadd.f32 %v2738_v47, %v1923_v12 }
 0x14e   : > { %v1955_v55 = vmax.f32 %v1947_v29, 0.0 }
 0x150   : > { %1963 = vst [vmem:[%s3447_s27 + $0x38] sm:$0xff] %v1955_v55 }
 0x151 PF: > { %s14_s17 = sadd.s32 1, %s2806_s17   ;;  %s3499_s15 = smov %s2802_s16 }
 0x152   : > { %p11_p5 = scmp.ge.s32.totalorder %s14_s17, 4   ;;  %s3500_s16 = smov %s3502_s18 }
 0x154   :  { %13 = sbr.rel (!%p11_p5) target bundleno = 2 (0x2), region = 80 }

</bundles_post_ra>
